<compile_context>
chip_gen: v5e
topology: v5e:2x2
jax: 0.10.0
libtpu: 0.0.40
codegen_flags: <defaults>
</compile_context>

<pallas_src>
import functools

import jax
import jax.numpy as jnp
from jax.experimental import pallas as pl
from jax.experimental.pallas import tpu as pltpu

_VMEM = functools.partial(pl.BlockSpec, memory_space=pltpu.MemorySpace.VMEM)

NODE_TYPES = ("user", "restaurant", "category")
_NT = (((1,), (1,)), ((), ()))  # dot_general dims: contract last dim of both (A @ B.T)


# ----------------------------- Slab packing (hoisted, done once) -----------------------------

def pack_slab(named, row_align=8):
    """Stack [r_i, c_i] f32 arrays along rows into one [R, max c_i] zero-padded slab.

    Row starts are aligned to `row_align` sublanes so all in-kernel slices are tile-friendly.
    Returns (slab, layout) with layout[name] = (row_start, n_rows, n_cols) as static Python ints.
    """
    width = max(int(a.shape[1]) for _, a in named)
    layout, parts, row = {}, [], 0
    for name, a in named:
        a = jnp.asarray(a, jnp.float32)
        r, c = int(a.shape[0]), int(a.shape[1])
        r_pad = (-r) % row_align
        layout[name] = (row, r, c)
        parts.append(jnp.pad(a, ((0, r_pad), (0, width - c))))
        row += r + r_pad
    return jnp.concatenate(parts, axis=0), layout


# ----------------------------- Fused 2-layer kernel -----------------------------

def make_fused_kernel(x_layout, g_layout, p1_layout, p2_layout):
    NU = x_layout["xu"][1]
    NR = x_layout["xr"][1]
    NC = x_layout["xc"][1]
    f32 = jnp.float32

    def gat(x_src, x_dst, adj, bd, bs, amean, eattr, ws, wd, we, att, bias):
        att_src, att_dst, att_edge = att[0:1, :], att[1:2, :], att[2:3, :]
        n_dst, n_src = adj.shape
        # source projection (needed for the aggregation matmul)
        hs = jnp.dot(x_src, ws, preferred_element_type=f32)                          # [Ns, H]
        # per-source logit as a lane-oriented row (no transpose / no [*,1] HBM traffic)
        a_src = jax.lax.dot_general(att_src, hs, _NT, preferred_element_type=f32)    # [1, Ns]
        # per-destination logit: fold W_dst into att_dst so hd is never materialized
        wd_att = jax.lax.dot_general(wd, att_dst, _NT, preferred_element_type=f32)   # [Fd, 1]
        a_dst = jnp.dot(x_dst, wd_att, preferred_element_type=f32)                   # [Nd, 1]
        # per-edge logit: fold W_edge into att_edge (no [E,H] / [Nd,H] intermediates)
        we_att = jax.lax.dot_general(we, att_edge, _NT, preferred_element_type=f32)  # [Ed, 1]
        a_edge = jnp.dot(eattr, we_att, preferred_element_type=f32)                  # [E, 1]
        alpha = jnp.dot(bd, a_edge * bs, preferred_element_type=f32)                 # [Nd, Ns]
        # self loops (fill_value='mean'): per-dst mean of incoming edge attrs, same fold
        a_self = jnp.dot(amean, we_att, preferred_element_type=f32)                  # [Nd, 1]
        # identity mask generated in-kernel (VPU filler) instead of DMA'd from HBM
        rows = jax.lax.broadcasted_iota(jnp.int32, (n_dst, n_src), 0)
        cols = jax.lax.broadcasted_iota(jnp.int32, (n_dst, n_src), 1)
        eye = (rows == cols).astype(f32)
        alpha = alpha * (1.0 - eye) + eye * a_self
        adj_sl = jnp.maximum(adj, eye)                                               # add self loops
        # LeakyReLU(0.2) + masked per-destination softmax (attn dropout disabled: eval)
        logits = a_dst + a_src + alpha
        logits = jnp.where(logits > 0, logits, 0.2 * logits)
        masked = jnp.where(adj_sl > 0, logits, f32(-1e30))
        m = jnp.max(masked, axis=-1, keepdims=True)
        p = jnp.exp(masked - m) * adj_sl
        s = jnp.sum(p, axis=-1, keepdims=True)
        attn = p * pl.reciprocal(s + 1e-16, approx=True)                             # PyG softmax eps
        return jnp.dot(attn, hs, preferred_element_type=f32) + bias

    def sage(x_src, x_dst, adj_norm, wl, bl, wr):
        agg = jnp.dot(adj_norm, x_src, preferred_element_type=f32)                   # mean aggregation
        return (jnp.dot(agg, wl, preferred_element_type=f32) + bl
                + jnp.dot(x_dst, wr, preferred_element_type=f32))

    def bn_relu(x, bn):
        gamma, beta, mean, var = bn[0:1, :], bn[1:2, :], bn[2:3, :], bn[3:4, :]
        y = (x - mean) * jax.lax.rsqrt(var + 1e-5) * gamma + beta
        return jnp.maximum(y, 0.0)

    def kernel(x_ref, g_ref, p1_ref, p2_ref, out_ref):
        def rd(ref, layout, name):
            r0, nr, nc = layout[name]
            return ref[r0:r0 + nr, 0:nc]          # static slice, 8-aligned row start

        G = lambda n: rd(g_ref, g_layout, n)
        # graph structure loaded once, shared by both layers
        adj_ur, bd_ur, bs_ur = G("adj_ur"), G("bd_ur"), G("bs_ur")
        amean_ur, eattr_ur = G("amean_ur"), G("eattr_ur")
        adj_ru, bd_ru, bs_ru = G("adj_ru"), G("bd_ru"), G("bs_ru")
        amean_ru, eattr_ru = G("amean_ru"), G("eattr_ru")
        adjn_rc, adjn_cr = G("adjn_rc"), G("adjn_cr")

        def layer(xu, xr, xc, p_ref, p_layout):
            P = lambda n: rd(p_ref, p_layout, n)
            out_rest_gat = gat(xu, xr, adj_ur, bd_ur, bs_ur, amean_ur, eattr_ur,
                               P("ur_ws"), P("ur_wd"), P("ur_we"), P("ur_att"), P("ur_b"))
            out_user = gat(xr, xu, adj_ru, bd_ru, bs_ru, amean_ru, eattr_ru,
                           P("ru_ws"), P("ru_wd"), P("ru_we"), P("ru_att"), P("ru_b"))
            out_cat = sage(xr, xc, adjn_rc, P("rc_wl"), P("rc_bl"), P("rc_wr"))
            out_rest_sage = sage(xc, xr, adjn_cr, P("cr_wl"), P("cr_bl"), P("cr_wr"))
            # HeteroConv 'sum' across edge types sharing a dst type, then eval BN + ReLU, fused.
            return (bn_relu(out_user, P("bn_u")),
                    bn_relu(out_rest_gat + out_rest_sage, P("bn_r")),
                    bn_relu(out_cat, P("bn_c")))

        xu = rd(x_ref, x_layout, "xu")
        xr = rd(x_ref, x_layout, "xr")
        xc = rd(x_ref, x_layout, "xc")
        xu, xr, xc = layer(xu, xr, xc, p1_ref, p1_layout)   # conv1 + bn1 + relu
        xu, xr, xc = layer(xu, xr, xc, p2_ref, p2_layout)   # conv2 + bn2 + relu (inputs stay in VMEM)

        # single concatenated output (one DMA instead of three masked ones)
        out_ref[0:NU, :] = xu
        out_ref[NU:NU + NR, :] = xr
        out_ref[NU + NR:NU + NR + NC, :] = xc

    return kernel, (NU, NR, NC)


def make_forward(x_layout, g_layout, p1_layout, p2_layout, hidden):
    kernel, (NU, NR, NC) = make_fused_kernel(x_layout, g_layout, p1_layout, p2_layout)
    n_total = NU + NR + NC

    @jax.jit
    def forward(x_slab, g_slab, p1_slab, p2_slab):
        out = pl.pallas_call(
            kernel,
            out_shape=jax.ShapeDtypeStruct((n_total, hidden), jnp.float32),
            in_specs=[_VMEM(), _VMEM(), _VMEM(), _VMEM()],
            out_specs=_VMEM(),
        )(x_slab, g_slab, p1_slab, p2_slab)
        return {"user": out[0:NU],
                "restaurant": out[NU:NU + NR],
                "category": out[NU + NR:n_total]}

    return forward


# -------------------- Graph preprocessing (hoisted, done once) --------------------

def build_graph(edge_index_dict, edge_attr_dict, n_user, n_rest, n_cat):
    """Dense adjacency / incidence / self-loop-mean tensors packed into ONE slab."""
    ur = ("user", "reviews", "restaurant")
    ru = ("restaurant", "reviewed_by", "user")
    rc = ("restaurant", "belongs_to", "category")
    cr = ("category", "has", "restaurant")

    def incidences(edge_index, n_src, n_dst):
        src, dst = edge_index[0], edge_index[1]
        bs = (src[:, None] == jnp.arange(n_src)[None, :]).astype(jnp.float32)   # [E, Ns]
        bd = (jnp.arange(n_dst)[:, None] == dst[None, :]).astype(jnp.float32)   # [Nd, E]
        return bs, bd

    def gat_rel(edge_index, edge_attr, n_src, n_dst):
        bs, bd = incidences(edge_index, n_src, n_dst)
        adj = jnp.dot(bd, bs)                                   # [Nd, Ns] (self loops added in-kernel)
        deg = jnp.sum(bd, axis=-1, keepdims=True)
        amean = jnp.dot(bd, edge_attr) / jnp.maximum(deg, 1.0)  # fill_value='mean'
        return adj, bd, bs, amean

    def sage_rel(edge_index, n_src, n_dst):
        bs, bd = incidences(edge_index, n_src, n_dst)
        adj = jnp.dot(bd, bs)
        deg = jnp.sum(adj, axis=-1, keepdims=True)
        return adj / jnp.maximum(deg, 1.0)                      # pre-normalized mean aggregation

    adj_ur, bd_ur, bs_ur, am_ur = gat_rel(edge_index_dict[ur], edge_attr_dict[ur], n_user, n_rest)
    adj_ru, bd_ru, bs_ru, am_ru = gat_rel(edge_index_dict[ru], edge_attr_dict[ru], n_rest, n_user)
    adjn_rc = sage_rel(edge_index_dict[rc], n_rest, n_cat)
    adjn_cr = sage_rel(edge_index_dict[cr], n_cat, n_rest)

    named = [
        ("adj_ur", adj_ur), ("bd_ur", bd_ur), ("bs_ur", bs_ur),
        ("amean_ur", am_ur), ("eattr_ur", edge_attr_dict[ur]),
        ("adj_ru", adj_ru), ("bd_ru", bd_ru), ("bs_ru", bs_ru),
        ("amean_ru", am_ru), ("eattr_ru", edge_attr_dict[ru]),
        ("adjn_rc", adjn_rc), ("adjn_cr", adjn_cr),
    ]
    return pack_slab(named)


# ----------------------------- Parameter init + packing -----------------------------

def init_gat_params(key, f_src, f_dst, e_dim, h):
    ks = jax.random.split(key, 4)
    return dict(
        W_src=0.1 * jax.random.normal(ks[0], (f_src, h), jnp.float32),
        W_dst=0.1 * jax.random.normal(ks[1], (f_dst, h), jnp.float32),
        W_edge=0.1 * jax.random.normal(ks[2], (e_dim, h), jnp.float32),
        att=0.1 * jax.random.normal(ks[3], (3, h), jnp.float32),   # rows: att_src, att_dst, att_edge
        bias=jnp.zeros((1, h), jnp.float32),
    )


def init_sage_params(key, f_src, f_dst, h):
    k1, k2 = jax.random.split(key)
    return dict(
        W_l=0.1 * jax.random.normal(k1, (f_src, h), jnp.float32),
        b_l=jnp.zeros((1, h), jnp.float32),
        W_r=0.1 * jax.random.normal(k2, (f_dst, h), jnp.float32),
    )


def init_bn_params(h):
    # rows: gamma, beta, running_mean, running_var (eval mode)
    return jnp.stack([jnp.ones((h,), jnp.float32), jnp.zeros((h,), jnp.float32),
                      jnp.zeros((h,), jnp.float32), jnp.ones((h,), jnp.float32)])


def init_params(key, f_user, f_rest, f_cat, h, e_dim):
    ks = iter(jax.random.split(key, 16))
    conv1 = dict(gat_ur=init_gat_params(next(ks), f_user, f_rest, e_dim, h),
                 gat_ru=init_gat_params(next(ks), f_rest, f_user, e_dim, h),
                 sage_rc=init_sage_params(next(ks), f_rest, f_cat, h),
                 sage_cr=init_sage_params(next(ks), f_cat, f_rest, h))
    conv2 = dict(gat_ur=init_gat_params(next(ks), h, h, e_dim, h),
                 gat_ru=init_gat_params(next(ks), h, h, e_dim, h),
                 sage_rc=init_sage_params(next(ks), h, h, h),
                 sage_cr=init_sage_params(next(ks), h, h, h))
    bn1 = {k: init_bn_params(h) for k in NODE_TYPES}
    bn2 = {k: init_bn_params(h) for k in NODE_TYPES}
    return dict(conv1=conv1, conv2=conv2, bn1=bn1, bn2=bn2)


def pack_layer_params(conv_p, bn_p):
    """Pack one hetero layer's parameters (GAT x2, SAGE x2, BN x3) into a single slab."""
    named = []
    for tag, pre in (("gat_ur", "ur"), ("gat_ru", "ru")):
        g = conv_p[tag]
        named += [(pre + "_ws", g["W_src"]), (pre + "_wd", g["W_dst"]),
                  (pre + "_we", g["W_edge"]), (pre + "_att", g["att"]), (pre + "_b", g["bias"])]
    for tag, pre in (("sage_rc", "rc"), ("sage_cr", "cr")):
        s = conv_p[tag]
        named += [(pre + "_wl", s["W_l"]), (pre + "_bl", s["b_l"]), (pre + "_wr", s["W_r"])]
    named += [("bn_u", bn_p["user"]), ("bn_r", bn_p["restaurant"]), ("bn_c", bn_p["category"])]
    return pack_slab(named)


# ----------------------------- Main -----------------------------

if __name__ == "__main__":
    HIDDEN, E_DIM = 32, 8
    N_USER, N_REST, N_CAT = 16, 16, 8
    F_USER, F_REST, F_CAT = 12, 10, 6

    root = jax.random.PRNGKey(0)
    keys = jax.random.split(root, 8)

    x_dict = {
        "user": jax.random.normal(keys[0], (N_USER, F_USER), jnp.float32),
        "restaurant": jax.random.normal(keys[1], (N_REST, F_REST), jnp.float32),
        "category": jax.random.normal(keys[2], (N_CAT, F_CAT), jnp.float32),
    }

    # review edges (deduplicated via permutation of all possible pairs)
    n_rev = 40
    perm = jax.random.permutation(keys[3], N_USER * N_REST)[:n_rev]
    u_idx = (perm // N_REST).astype(jnp.int32)
    r_idx = (perm % N_REST).astype(jnp.int32)
    rev_attr = jax.random.normal(keys[4], (n_rev, E_DIM), jnp.float32)

    # restaurant<->category edges
    n_bel = 24
    perm2 = jax.random.permutation(keys[5], N_REST * N_CAT)[:n_bel]
    r2_idx = (perm2 // N_CAT).astype(jnp.int32)
    c2_idx = (perm2 % N_CAT).astype(jnp.int32)

    edge_index_dict = {
        ("user", "reviews", "restaurant"): jnp.stack([u_idx, r_idx]),
        ("restaurant", "reviewed_by", "user"): jnp.stack([r_idx, u_idx]),
        ("restaurant", "belongs_to", "category"): jnp.stack([r2_idx, c2_idx]),
        ("category", "has", "restaurant"): jnp.stack([c2_idx, r2_idx]),
    }
    edge_attr_dict = {
        ("user", "reviews", "restaurant"): rev_attr,
        ("restaurant", "reviewed_by", "user"): rev_attr,
    }

    params = init_params(keys[6], F_USER, F_REST, F_CAT, HIDDEN, E_DIM)

    # everything pre-packed ONCE into 4 slabs: node features, graph structure, layer-1/2 params
    x_slab, x_layout = pack_slab([("xu", x_dict["user"]),
                                  ("xr", x_dict["restaurant"]),
                                  ("xc", x_dict["category"])])
    g_slab, g_layout = build_graph(edge_index_dict, edge_attr_dict, N_USER, N_REST, N_CAT)
    p1_slab, p1_layout = pack_layer_params(params["conv1"], params["bn1"])
    p2_slab, p2_layout = pack_layer_params(params["conv2"], params["bn2"])

    forward = make_forward(x_layout, g_layout, p1_layout, p2_layout, HIDDEN)
    out = forward(x_slab, g_slab, p1_slab, p2_slab)
    out = jax.block_until_ready(out)

    assert out["user"].shape == (N_USER, HIDDEN)
    assert out["restaurant"].shape == (N_REST, HIDDEN)
    assert out["category"].shape == (N_CAT, HIDDEN)
    for k in NODE_TYPES:
        assert bool(jnp.all(jnp.isfinite(out[k])))

    print("KERNEL_OK")
</pallas_src>

<mosaic_0001>
module attributes {stable_mosaic.version = 11 : i64} {
  func.func @kernel(%arg0: memref<40x12xf32, #tpu.memory_space<vmem>>, %arg1: memref<280x40xf32, #tpu.memory_space<vmem>>, %arg2: memref<200x32xf32, #tpu.memory_space<vmem>>, %arg3: memref<344x32xf32, #tpu.memory_space<vmem>>, %arg4: memref<40x32xf32, #tpu.memory_space<vmem>>) attributes {dimension_semantics = [], scalar_prefetch = 0 : i64, scratch_operands = 0 : i64, tpu.core_type = #tpu.core_type<tc>} {
    %c0 = arith.constant 0 : index
    %c0_0 = arith.constant 0 : index
    %0 = vector.load %arg1[%c0, %c0_0] : memref<280x40xf32, #tpu.memory_space<vmem>>, vector<16x16xf32>
    %c16 = arith.constant 16 : index
    %c0_1 = arith.constant 0 : index
    %1 = vector.load %arg1[%c16, %c0_1] : memref<280x40xf32, #tpu.memory_space<vmem>>, vector<16x40xf32>
    %c32 = arith.constant 32 : index
    %c0_2 = arith.constant 0 : index
    %2 = vector.load %arg1[%c32, %c0_2] : memref<280x40xf32, #tpu.memory_space<vmem>>, vector<40x16xf32>
    %c72 = arith.constant 72 : index
    %c0_3 = arith.constant 0 : index
    %3 = vector.load %arg1[%c72, %c0_3] : memref<280x40xf32, #tpu.memory_space<vmem>>, vector<16x8xf32>
    %c88 = arith.constant 88 : index
    %c0_4 = arith.constant 0 : index
    %4 = vector.load %arg1[%c88, %c0_4] : memref<280x40xf32, #tpu.memory_space<vmem>>, vector<40x8xf32>
    %c128 = arith.constant 128 : index
    %c0_5 = arith.constant 0 : index
    %5 = vector.load %arg1[%c128, %c0_5] : memref<280x40xf32, #tpu.memory_space<vmem>>, vector<16x16xf32>
    %c144 = arith.constant 144 : index
    %c0_6 = arith.constant 0 : index
    %6 = vector.load %arg1[%c144, %c0_6] : memref<280x40xf32, #tpu.memory_space<vmem>>, vector<16x40xf32>
    %c160 = arith.constant 160 : index
    %c0_7 = arith.constant 0 : index
    %7 = vector.load %arg1[%c160, %c0_7] : memref<280x40xf32, #tpu.memory_space<vmem>>, vector<40x16xf32>
    %c200 = arith.constant 200 : index
    %c0_8 = arith.constant 0 : index
    %8 = vector.load %arg1[%c200, %c0_8] : memref<280x40xf32, #tpu.memory_space<vmem>>, vector<16x8xf32>
    %c216 = arith.constant 216 : index
    %c0_9 = arith.constant 0 : index
    %9 = vector.load %arg1[%c216, %c0_9] : memref<280x40xf32, #tpu.memory_space<vmem>>, vector<40x8xf32>
    %c256 = arith.constant 256 : index
    %c0_10 = arith.constant 0 : index
    %10 = vector.load %arg1[%c256, %c0_10] : memref<280x40xf32, #tpu.memory_space<vmem>>, vector<8x16xf32>
    %c264 = arith.constant 264 : index
    %c0_11 = arith.constant 0 : index
    %11 = vector.load %arg1[%c264, %c0_11] : memref<280x40xf32, #tpu.memory_space<vmem>>, vector<16x8xf32>
    %c0_12 = arith.constant 0 : index
    %c0_13 = arith.constant 0 : index
    %12 = vector.load %arg0[%c0_12, %c0_13] : memref<40x12xf32, #tpu.memory_space<vmem>>, vector<16x12xf32>
    %c16_14 = arith.constant 16 : index
    %c0_15 = arith.constant 0 : index
    %13 = vector.load %arg0[%c16_14, %c0_15] : memref<40x12xf32, #tpu.memory_space<vmem>>, vector<16x10xf32>
    %c32_16 = arith.constant 32 : index
    %c0_17 = arith.constant 0 : index
    %14 = vector.load %arg0[%c32_16, %c0_17] : memref<40x12xf32, #tpu.memory_space<vmem>>, vector<8x6xf32>
    %c0_18 = arith.constant 0 : index
    %c0_19 = arith.constant 0 : index
    %15 = vector.load %arg2[%c0_18, %c0_19] : memref<200x32xf32, #tpu.memory_space<vmem>>, vector<12x32xf32>
    %c16_20 = arith.constant 16 : index
    %c0_21 = arith.constant 0 : index
    %16 = vector.load %arg2[%c16_20, %c0_21] : memref<200x32xf32, #tpu.memory_space<vmem>>, vector<10x32xf32>
    %c32_22 = arith.constant 32 : index
    %c0_23 = arith.constant 0 : index
    %17 = vector.load %arg2[%c32_22, %c0_23] : memref<200x32xf32, #tpu.memory_space<vmem>>, vector<8x32xf32>
    %c40 = arith.constant 40 : index
    %c0_24 = arith.constant 0 : index
    %18 = vector.load %arg2[%c40, %c0_24] : memref<200x32xf32, #tpu.memory_space<vmem>>, vector<3x32xf32>
    %c48 = arith.constant 48 : index
    %c0_25 = arith.constant 0 : index
    %19 = vector.load %arg2[%c48, %c0_25] : memref<200x32xf32, #tpu.memory_space<vmem>>, vector<1x32xf32>
    %20 = vector.extract_strided_slice %18 {offsets = [0, 0], sizes = [1, 32], strides = [1, 1]} : vector<3x32xf32> to vector<1x32xf32>
    %21 = vector.extract_strided_slice %18 {offsets = [1, 0], sizes = [1, 32], strides = [1, 1]} : vector<3x32xf32> to vector<1x32xf32>
    %22 = vector.extract_strided_slice %18 {offsets = [2, 0], sizes = [1, 32], strides = [1, 1]} : vector<3x32xf32> to vector<1x32xf32>
    %cst = arith.constant dense<0.000000e+00> : vector<16x32xf32>
    %23 = tpu.matmul %12, %15, %cst {dimension_numbers = #tpu.dot_dimension_numbers<[1], [0], [0], [1], [0, 0, 1, 1], [], []>} : vector<16x12xf32>, vector<12x32xf32>, vector<16x32xf32> -> vector<16x32xf32>
    %cst_26 = arith.constant dense<0.000000e+00> : vector<1x16xf32>
    %24 = tpu.matmul %20, %23, %cst_26 {dimension_numbers = #tpu.dot_dimension_numbers<[1], [1], [0], [0], [0, 0, 1, 0], [], []>} : vector<1x32xf32>, vector<16x32xf32>, vector<1x16xf32> -> vector<1x16xf32>
    %cst_27 = arith.constant dense<0.000000e+00> : vector<10x1xf32>
    %25 = tpu.matmul %16, %21, %cst_27 {dimension_numbers = #tpu.dot_dimension_numbers<[1], [1], [0], [0], [0, 0, 1, 0], [], []>} : vector<10x32xf32>, vector<1x32xf32>, vector<10x1xf32> -> vector<10x1xf32>
    %cst_28 = arith.constant dense<0.000000e+00> : vector<16x1xf32>
    %26 = tpu.matmul %13, %25, %cst_28 {dimension_numbers = #tpu.dot_dimension_numbers<[1], [0], [0], [1], [0, 0, 1, 1], [], []>} : vector<16x10xf32>, vector<10x1xf32>, vector<16x1xf32> -> vector<16x1xf32>
    %cst_29 = arith.constant dense<0.000000e+00> : vector<8x1xf32>
    %27 = tpu.matmul %17, %22, %cst_29 {dimension_numbers = #tpu.dot_dimension_numbers<[1], [1], [0], [0], [0, 0, 1, 0], [], []>} : vector<8x32xf32>, vector<1x32xf32>, vector<8x1xf32> -> vector<8x1xf32>
    %cst_30 = arith.constant dense<0.000000e+00> : vector<40x1xf32>
    %28 = tpu.matmul %4, %27, %cst_30 {dimension_numbers = #tpu.dot_dimension_numbers<[1], [0], [0], [1], [0, 0, 1, 1], [], []>} : vector<40x8xf32>, vector<8x1xf32>, vector<40x1xf32> -> vector<40x1xf32>
    %29 = vector.broadcast %28 : vector<40x1xf32> to vector<40x16xf32>
    %30 = arith.mulf %29, %2 : vector<40x16xf32>
    %cst_31 = arith.constant dense<0.000000e+00> : vector<16x16xf32>
    %31 = tpu.matmul %1, %30, %cst_31 {dimension_numbers = #tpu.dot_dimension_numbers<[1], [0], [0], [1], [0, 0, 1, 1], [], []>} : vector<16x40xf32>, vector<40x16xf32>, vector<16x16xf32> -> vector<16x16xf32>
    %cst_32 = arith.constant dense<0.000000e+00> : vector<16x1xf32>
    %32 = tpu.matmul %3, %27, %cst_32 {dimension_numbers = #tpu.dot_dimension_numbers<[1], [0], [0], [1], [0, 0, 1, 1], [], []>} : vector<16x8xf32>, vector<8x1xf32>, vector<16x1xf32> -> vector<16x1xf32>
    %33 = tpu.iota {dimensions = array<i32: 0>} : vector<16x16xi32>
    %34 = tpu.iota {dimensions = array<i32: 1>} : vector<16x16xi32>
    %35 = arith.cmpi eq, %33, %34 : vector<16x16xi32>
    %36 = arith.extui %35 : vector<16x16xi1> to vector<16x16xi32>
    %37 = arith.sitofp %36 : vector<16x16xi32> to vector<16x16xf32>
    %cst_33 = arith.constant 1.000000e+00 : f32
    %38 = vector.broadcast %cst_33 : f32 to vector<16x16xf32>
    %39 = arith.subf %38, %37 : vector<16x16xf32>
    %40 = arith.mulf %31, %39 : vector<16x16xf32>
    %41 = vector.broadcast %32 : vector<16x1xf32> to vector<16x16xf32>
    %42 = arith.mulf %37, %41 : vector<16x16xf32>
    %43 = arith.addf %40, %42 : vector<16x16xf32>
    %44 = arith.maximumf %0, %37 : vector<16x16xf32>
    %45 = vector.broadcast %26 : vector<16x1xf32> to vector<16x16xf32>
    %46 = vector.broadcast %24 : vector<1x16xf32> to vector<16x16xf32>
    %47 = arith.addf %45, %46 : vector<16x16xf32>
    %48 = arith.addf %47, %43 : vector<16x16xf32>
    %cst_34 = arith.constant 0.000000e+00 : f32
    %49 = vector.broadcast %cst_34 : f32 to vector<16x16xf32>
    %50 = arith.cmpf ogt, %48, %49 : vector<16x16xf32>
    %cst_35 = arith.constant 2.000000e-01 : f32
    %51 = vector.broadcast %cst_35 : f32 to vector<16x16xf32>
    %52 = arith.mulf %51, %48 : vector<16x16xf32>
    %53 = arith.select %50, %48, %52 : vector<16x16xi1>, vector<16x16xf32>
    %cst_36 = arith.constant 0.000000e+00 : f32
    %54 = vector.broadcast %cst_36 : f32 to vector<16x16xf32>
    %55 = arith.cmpf ogt, %44, %54 : vector<16x16xf32>
    %cst_37 = arith.constant -1.000000e+30 : f32
    %56 = vector.broadcast %cst_37 : f32 to vector<16x16xf32>
    %57 = arith.select %55, %53, %56 : vector<16x16xi1>, vector<16x16xf32>
    %cst_38 = arith.constant dense<0xFF800000> : vector<16xf32>
    %58 = vector.multi_reduction <maximumf>, %57, %cst_38 [1] : vector<16x16xf32> to vector<16xf32>
    %59 = vector.shape_cast %58 : vector<16xf32> to vector<16x1xf32>
    %60 = vector.broadcast %59 : vector<16x1xf32> to vector<16x16xf32>
    %61 = arith.subf %57, %60 : vector<16x16xf32>
    %62 = math.exp %61 : vector<16x16xf32>
    %63 = arith.mulf %62, %44 : vector<16x16xf32>
    %cst_39 = arith.constant dense<0.000000e+00> : vector<16xf32>
    %64 = vector.multi_reduction <add>, %63, %cst_39 [1] : vector<16x16xf32> to vector<16xf32>
    %65 = vector.shape_cast %64 : vector<16xf32> to vector<16x1xf32>
    %cst_40 = arith.constant 1.000000e-16 : f32
    %66 = vector.broadcast %cst_40 : f32 to vector<16x1xf32>
    %67 = arith.addf %65, %66 : vector<16x1xf32>
    %68 = tpu.reciprocal %67 {approx = true} : vector<16x1xf32> -> vector<16x1xf32>
    %69 = vector.broadcast %68 : vector<16x1xf32> to vector<16x16xf32>
    %70 = arith.mulf %63, %69 : vector<16x16xf32>
    %cst_41 = arith.constant dense<0.000000e+00> : vector<16x32xf32>
    %71 = tpu.matmul %70, %23, %cst_41 {dimension_numbers = #tpu.dot_dimension_numbers<[1], [0], [0], [1], [0, 0, 1, 1], [], []>} : vector<16x16xf32>, vector<16x32xf32>, vector<16x32xf32> -> vector<16x32xf32>
    %72 = vector.broadcast %19 : vector<1x32xf32> to vector<16x32xf32>
    %73 = arith.addf %71, %72 : vector<16x32xf32>
    %c56 = arith.constant 56 : index
    %c0_42 = arith.constant 0 : index
    %74 = vector.load %arg2[%c56, %c0_42] : memref<200x32xf32, #tpu.memory_space<vmem>>, vector<10x32xf32>
    %c72_43 = arith.constant 72 : index
    %c0_44 = arith.constant 0 : index
    %75 = vector.load %arg2[%c72_43, %c0_44] : memref<200x32xf32, #tpu.memory_space<vmem>>, vector<12x32xf32>
    %c88_45 = arith.constant 88 : index
    %c0_46 = arith.constant 0 : index
    %76 = vector.load %arg2[%c88_45, %c0_46] : memref<200x32xf32, #tpu.memory_space<vmem>>, vector<8x32xf32>
    %c96 = arith.constant 96 : index
    %c0_47 = arith.constant 0 : index
    %77 = vector.load %arg2[%c96, %c0_47] : memref<200x32xf32, #tpu.memory_space<vmem>>, vector<3x32xf32>
    %c104 = arith.constant 104 : index
    %c0_48 = arith.constant 0 : index
    %78 = vector.load %arg2[%c104, %c0_48] : memref<200x32xf32, #tpu.memory_space<vmem>>, vector<1x32xf32>
    %79 = vector.extract_strided_slice %77 {offsets = [0, 0], sizes = [1, 32], strides = [1, 1]} : vector<3x32xf32> to vector<1x32xf32>
    %80 = vector.extract_strided_slice %77 {offsets = [1, 0], sizes = [1, 32], strides = [1, 1]} : vector<3x32xf32> to vector<1x32xf32>
    %81 = vector.extract_strided_slice %77 {offsets = [2, 0], sizes = [1, 32], strides = [1, 1]} : vector<3x32xf32> to vector<1x32xf32>
    %cst_49 = arith.constant dense<0.000000e+00> : vector<16x32xf32>
    %82 = tpu.matmul %13, %74, %cst_49 {dimension_numbers = #tpu.dot_dimension_numbers<[1], [0], [0], [1], [0, 0, 1, 1], [], []>} : vector<16x10xf32>, vector<10x32xf32>, vector<16x32xf32> -> vector<16x32xf32>
    %cst_50 = arith.constant dense<0.000000e+00> : vector<1x16xf32>
    %83 = tpu.matmul %79, %82, %cst_50 {dimension_numbers = #tpu.dot_dimension_numbers<[1], [1], [0], [0], [0, 0, 1, 0], [], []>} : vector<1x32xf32>, vector<16x32xf32>, vector<1x16xf32> -> vector<1x16xf32>
    %cst_51 = arith.constant dense<0.000000e+00> : vector<12x1xf32>
    %84 = tpu.matmul %75, %80, %cst_51 {dimension_numbers = #tpu.dot_dimension_numbers<[1], [1], [0], [0], [0, 0, 1, 0], [], []>} : vector<12x32xf32>, vector<1x32xf32>, vector<12x1xf32> -> vector<12x1xf32>
    %cst_52 = arith.constant dense<0.000000e+00> : vector<16x1xf32>
    %85 = tpu.matmul %12, %84, %cst_52 {dimension_numbers = #tpu.dot_dimension_numbers<[1], [0], [0], [1], [0, 0, 1, 1], [], []>} : vector<16x12xf32>, vector<12x1xf32>, vector<16x1xf32> -> vector<16x1xf32>
    %cst_53 = arith.constant dense<0.000000e+00> : vector<8x1xf32>
    %86 = tpu.matmul %76, %81, %cst_53 {dimension_numbers = #tpu.dot_dimension_numbers<[1], [1], [0], [0], [0, 0, 1, 0], [], []>} : vector<8x32xf32>, vector<1x32xf32>, vector<8x1xf32> -> vector<8x1xf32>
    %cst_54 = arith.constant dense<0.000000e+00> : vector<40x1xf32>
    %87 = tpu.matmul %9, %86, %cst_54 {dimension_numbers = #tpu.dot_dimension_numbers<[1], [0], [0], [1], [0, 0, 1, 1], [], []>} : vector<40x8xf32>, vector<8x1xf32>, vector<40x1xf32> -> vector<40x1xf32>
    %88 = vector.broadcast %87 : vector<40x1xf32> to vector<40x16xf32>
    %89 = arith.mulf %88, %7 : vector<40x16xf32>
    %cst_55 = arith.constant dense<0.000000e+00> : vector<16x16xf32>
    %90 = tpu.matmul %6, %89, %cst_55 {dimension_numbers = #tpu.dot_dimension_numbers<[1], [0], [0], [1], [0, 0, 1, 1], [], []>} : vector<16x40xf32>, vector<40x16xf32>, vector<16x16xf32> -> vector<16x16xf32>
    %cst_56 = arith.constant dense<0.000000e+00> : vector<16x1xf32>
    %91 = tpu.matmul %8, %86, %cst_56 {dimension_numbers = #tpu.dot_dimension_numbers<[1], [0], [0], [1], [0, 0, 1, 1], [], []>} : vector<16x8xf32>, vector<8x1xf32>, vector<16x1xf32> -> vector<16x1xf32>
    %92 = tpu.iota {dimensions = array<i32: 0>} : vector<16x16xi32>
    %93 = tpu.iota {dimensions = array<i32: 1>} : vector<16x16xi32>
    %94 = arith.cmpi eq, %92, %93 : vector<16x16xi32>
    %95 = arith.extui %94 : vector<16x16xi1> to vector<16x16xi32>
    %96 = arith.sitofp %95 : vector<16x16xi32> to vector<16x16xf32>
    %cst_57 = arith.constant 1.000000e+00 : f32
    %97 = vector.broadcast %cst_57 : f32 to vector<16x16xf32>
    %98 = arith.subf %97, %96 : vector<16x16xf32>
    %99 = arith.mulf %90, %98 : vector<16x16xf32>
    %100 = vector.broadcast %91 : vector<16x1xf32> to vector<16x16xf32>
    %101 = arith.mulf %96, %100 : vector<16x16xf32>
    %102 = arith.addf %99, %101 : vector<16x16xf32>
    %103 = arith.maximumf %5, %96 : vector<16x16xf32>
    %104 = vector.broadcast %85 : vector<16x1xf32> to vector<16x16xf32>
    %105 = vector.broadcast %83 : vector<1x16xf32> to vector<16x16xf32>
    %106 = arith.addf %104, %105 : vector<16x16xf32>
    %107 = arith.addf %106, %102 : vector<16x16xf32>
    %cst_58 = arith.constant 0.000000e+00 : f32
    %108 = vector.broadcast %cst_58 : f32 to vector<16x16xf32>
    %109 = arith.cmpf ogt, %107, %108 : vector<16x16xf32>
    %cst_59 = arith.constant 2.000000e-01 : f32
    %110 = vector.broadcast %cst_59 : f32 to vector<16x16xf32>
    %111 = arith.mulf %110, %107 : vector<16x16xf32>
    %112 = arith.select %109, %107, %111 : vector<16x16xi1>, vector<16x16xf32>
    %cst_60 = arith.constant 0.000000e+00 : f32
    %113 = vector.broadcast %cst_60 : f32 to vector<16x16xf32>
    %114 = arith.cmpf ogt, %103, %113 : vector<16x16xf32>
    %cst_61 = arith.constant -1.000000e+30 : f32
    %115 = vector.broadcast %cst_61 : f32 to vector<16x16xf32>
    %116 = arith.select %114, %112, %115 : vector<16x16xi1>, vector<16x16xf32>
    %cst_62 = arith.constant dense<0xFF800000> : vector<16xf32>
    %117 = vector.multi_reduction <maximumf>, %116, %cst_62 [1] : vector<16x16xf32> to vector<16xf32>
    %118 = vector.shape_cast %117 : vector<16xf32> to vector<16x1xf32>
    %119 = vector.broadcast %118 : vector<16x1xf32> to vector<16x16xf32>
    %120 = arith.subf %116, %119 : vector<16x16xf32>
    %121 = math.exp %120 : vector<16x16xf32>
    %122 = arith.mulf %121, %103 : vector<16x16xf32>
    %cst_63 = arith.constant dense<0.000000e+00> : vector<16xf32>
    %123 = vector.multi_reduction <add>, %122, %cst_63 [1] : vector<16x16xf32> to vector<16xf32>
    %124 = vector.shape_cast %123 : vector<16xf32> to vector<16x1xf32>
    %cst_64 = arith.constant 1.000000e-16 : f32
    %125 = vector.broadcast %cst_64 : f32 to vector<16x1xf32>
    %126 = arith.addf %124, %125 : vector<16x1xf32>
    %127 = tpu.reciprocal %126 {approx = true} : vector<16x1xf32> -> vector<16x1xf32>
    %128 = vector.broadcast %127 : vector<16x1xf32> to vector<16x16xf32>
    %129 = arith.mulf %122, %128 : vector<16x16xf32>
    %cst_65 = arith.constant dense<0.000000e+00> : vector<16x32xf32>
    %130 = tpu.matmul %129, %82, %cst_65 {dimension_numbers = #tpu.dot_dimension_numbers<[1], [0], [0], [1], [0, 0, 1, 1], [], []>} : vector<16x16xf32>, vector<16x32xf32>, vector<16x32xf32> -> vector<16x32xf32>
    %131 = vector.broadcast %78 : vector<1x32xf32> to vector<16x32xf32>
    %132 = arith.addf %130, %131 : vector<16x32xf32>
    %c112 = arith.constant 112 : index
    %c0_66 = arith.constant 0 : index
    %133 = vector.load %arg2[%c112, %c0_66] : memref<200x32xf32, #tpu.memory_space<vmem>>, vector<10x32xf32>
    %c128_67 = arith.constant 128 : index
    %c0_68 = arith.constant 0 : index
    %134 = vector.load %arg2[%c128_67, %c0_68] : memref<200x32xf32, #tpu.memory_space<vmem>>, vector<1x32xf32>
    %c136 = arith.constant 136 : index
    %c0_69 = arith.constant 0 : index
    %135 = vector.load %arg2[%c136, %c0_69] : memref<200x32xf32, #tpu.memory_space<vmem>>, vector<6x32xf32>
    %cst_70 = arith.constant dense<0.000000e+00> : vector<8x10xf32>
    %136 = tpu.matmul %10, %13, %cst_70 {dimension_numbers = #tpu.dot_dimension_numbers<[1], [0], [0], [1], [0, 0, 1, 1], [], []>} : vector<8x16xf32>, vector<16x10xf32>, vector<8x10xf32> -> vector<8x10xf32>
    %cst_71 = arith.constant dense<0.000000e+00> : vector<8x32xf32>
    %137 = tpu.matmul %136, %133, %cst_71 {dimension_numbers = #tpu.dot_dimension_numbers<[1], [0], [0], [1], [0, 0, 1, 1], [], []>} : vector<8x10xf32>, vector<10x32xf32>, vector<8x32xf32> -> vector<8x32xf32>
    %138 = vector.broadcast %134 : vector<1x32xf32> to vector<8x32xf32>
    %139 = arith.addf %137, %138 : vector<8x32xf32>
    %cst_72 = arith.constant dense<0.000000e+00> : vector<8x32xf32>
    %140 = tpu.matmul %14, %135, %cst_72 {dimension_numbers = #tpu.dot_dimension_numbers<[1], [0], [0], [1], [0, 0, 1, 1], [], []>} : vector<8x6xf32>, vector<6x32xf32>, vector<8x32xf32> -> vector<8x32xf32>
    %141 = arith.addf %139, %140 : vector<8x32xf32>
    %c144_73 = arith.constant 144 : index
    %c0_74 = arith.constant 0 : index
    %142 = vector.load %arg2[%c144_73, %c0_74] : memref<200x32xf32, #tpu.memory_space<vmem>>, vector<6x32xf32>
    %c152 = arith.constant 152 : index
    %c0_75 = arith.constant 0 : index
    %143 = vector.load %arg2[%c152, %c0_75] : memref<200x32xf32, #tpu.memory_space<vmem>>, vector<1x32xf32>
    %c160_76 = arith.constant 160 : index
    %c0_77 = arith.constant 0 : index
    %144 = vector.load %arg2[%c160_76, %c0_77] : memref<200x32xf32, #tpu.memory_space<vmem>>, vector<10x32xf32>
    %cst_78 = arith.constant dense<0.000000e+00> : vector<16x6xf32>
    %145 = tpu.matmul %11, %14, %cst_78 {dimension_numbers = #tpu.dot_dimension_numbers<[1], [0], [0], [1], [0, 0, 1, 1], [], []>} : vector<16x8xf32>, vector<8x6xf32>, vector<16x6xf32> -> vector<16x6xf32>
    %cst_79 = arith.constant dense<0.000000e+00> : vector<16x32xf32>
    %146 = tpu.matmul %145, %142, %cst_79 {dimension_numbers = #tpu.dot_dimension_numbers<[1], [0], [0], [1], [0, 0, 1, 1], [], []>} : vector<16x6xf32>, vector<6x32xf32>, vector<16x32xf32> -> vector<16x32xf32>
    %147 = vector.broadcast %143 : vector<1x32xf32> to vector<16x32xf32>
    %148 = arith.addf %146, %147 : vector<16x32xf32>
    %cst_80 = arith.constant dense<0.000000e+00> : vector<16x32xf32>
    %149 = tpu.matmul %13, %144, %cst_80 {dimension_numbers = #tpu.dot_dimension_numbers<[1], [0], [0], [1], [0, 0, 1, 1], [], []>} : vector<16x10xf32>, vector<10x32xf32>, vector<16x32xf32> -> vector<16x32xf32>
    %150 = arith.addf %148, %149 : vector<16x32xf32>
    %c176 = arith.constant 176 : index
    %c0_81 = arith.constant 0 : index
    %151 = vector.load %arg2[%c176, %c0_81] : memref<200x32xf32, #tpu.memory_space<vmem>>, vector<4x32xf32>
    %152 = vector.extract_strided_slice %151 {offsets = [0, 0], sizes = [1, 32], strides = [1, 1]} : vector<4x32xf32> to vector<1x32xf32>
    %153 = vector.extract_strided_slice %151 {offsets = [1, 0], sizes = [1, 32], strides = [1, 1]} : vector<4x32xf32> to vector<1x32xf32>
    %154 = vector.extract_strided_slice %151 {offsets = [2, 0], sizes = [1, 32], strides = [1, 1]} : vector<4x32xf32> to vector<1x32xf32>
    %155 = vector.extract_strided_slice %151 {offsets = [3, 0], sizes = [1, 32], strides = [1, 1]} : vector<4x32xf32> to vector<1x32xf32>
    %156 = vector.broadcast %154 : vector<1x32xf32> to vector<16x32xf32>
    %157 = arith.subf %132, %156 : vector<16x32xf32>
    %cst_82 = arith.constant 9.99999974E-6 : f32
    %158 = vector.broadcast %cst_82 : f32 to vector<1x32xf32>
    %159 = arith.addf %155, %158 : vector<1x32xf32>
    %160 = math.rsqrt %159 : vector<1x32xf32>
    %161 = vector.broadcast %160 : vector<1x32xf32> to vector<16x32xf32>
    %162 = arith.mulf %157, %161 : vector<16x32xf32>
    %163 = vector.broadcast %152 : vector<1x32xf32> to vector<16x32xf32>
    %164 = arith.mulf %162, %163 : vector<16x32xf32>
    %165 = vector.broadcast %153 : vector<1x32xf32> to vector<16x32xf32>
    %166 = arith.addf %164, %165 : vector<16x32xf32>
    %cst_83 = arith.constant 0.000000e+00 : f32
    %167 = vector.broadcast %cst_83 : f32 to vector<16x32xf32>
    %168 = arith.maximumf %166, %167 : vector<16x32xf32>
    %169 = arith.addf %73, %150 : vector<16x32xf32>
    %c184 = arith.constant 184 : index
    %c0_84 = arith.constant 0 : index
    %170 = vector.load %arg2[%c184, %c0_84] : memref<200x32xf32, #tpu.memory_space<vmem>>, vector<4x32xf32>
    %171 = vector.extract_strided_slice %170 {offsets = [0, 0], sizes = [1, 32], strides = [1, 1]} : vector<4x32xf32> to vector<1x32xf32>
    %172 = vector.extract_strided_slice %170 {offsets = [1, 0], sizes = [1, 32], strides = [1, 1]} : vector<4x32xf32> to vector<1x32xf32>
    %173 = vector.extract_strided_slice %170 {offsets = [2, 0], sizes = [1, 32], strides = [1, 1]} : vector<4x32xf32> to vector<1x32xf32>
    %174 = vector.extract_strided_slice %170 {offsets = [3, 0], sizes = [1, 32], strides = [1, 1]} : vector<4x32xf32> to vector<1x32xf32>
    %175 = vector.broadcast %173 : vector<1x32xf32> to vector<16x32xf32>
    %176 = arith.subf %169, %175 : vector<16x32xf32>
    %cst_85 = arith.constant 9.99999974E-6 : f32
    %177 = vector.broadcast %cst_85 : f32 to vector<1x32xf32>
    %178 = arith.addf %174, %177 : vector<1x32xf32>
    %179 = math.rsqrt %178 : vector<1x32xf32>
    %180 = vector.broadcast %179 : vector<1x32xf32> to vector<16x32xf32>
    %181 = arith.mulf %176, %180 : vector<16x32xf32>
    %182 = vector.broadcast %171 : vector<1x32xf32> to vector<16x32xf32>
    %183 = arith.mulf %181, %182 : vector<16x32xf32>
    %184 = vector.broadcast %172 : vector<1x32xf32> to vector<16x32xf32>
    %185 = arith.addf %183, %184 : vector<16x32xf32>
    %cst_86 = arith.constant 0.000000e+00 : f32
    %186 = vector.broadcast %cst_86 : f32 to vector<16x32xf32>
    %187 = arith.maximumf %185, %186 : vector<16x32xf32>
    %c192 = arith.constant 192 : index
    %c0_87 = arith.constant 0 : index
    %188 = vector.load %arg2[%c192, %c0_87] : memref<200x32xf32, #tpu.memory_space<vmem>>, vector<4x32xf32>
    %189 = vector.extract_strided_slice %188 {offsets = [0, 0], sizes = [1, 32], strides = [1, 1]} : vector<4x32xf32> to vector<1x32xf32>
    %190 = vector.extract_strided_slice %188 {offsets = [1, 0], sizes = [1, 32], strides = [1, 1]} : vector<4x32xf32> to vector<1x32xf32>
    %191 = vector.extract_strided_slice %188 {offsets = [2, 0], sizes = [1, 32], strides = [1, 1]} : vector<4x32xf32> to vector<1x32xf32>
    %192 = vector.extract_strided_slice %188 {offsets = [3, 0], sizes = [1, 32], strides = [1, 1]} : vector<4x32xf32> to vector<1x32xf32>
    %193 = vector.broadcast %191 : vector<1x32xf32> to vector<8x32xf32>
    %194 = arith.subf %141, %193 : vector<8x32xf32>
    %cst_88 = arith.constant 9.99999974E-6 : f32
    %195 = vector.broadcast %cst_88 : f32 to vector<1x32xf32>
    %196 = arith.addf %192, %195 : vector<1x32xf32>
    %197 = math.rsqrt %196 : vector<1x32xf32>
    %198 = vector.broadcast %197 : vector<1x32xf32> to vector<8x32xf32>
    %199 = arith.mulf %194, %198 : vector<8x32xf32>
    %200 = vector.broadcast %189 : vector<1x32xf32> to vector<8x32xf32>
    %201 = arith.mulf %199, %200 : vector<8x32xf32>
    %202 = vector.broadcast %190 : vector<1x32xf32> to vector<8x32xf32>
    %203 = arith.addf %201, %202 : vector<8x32xf32>
    %cst_89 = arith.constant 0.000000e+00 : f32
    %204 = vector.broadcast %cst_89 : f32 to vector<8x32xf32>
    %205 = arith.maximumf %203, %204 : vector<8x32xf32>
    %c0_90 = arith.constant 0 : index
    %c0_91 = arith.constant 0 : index
    %206 = vector.load %arg3[%c0_90, %c0_91] : memref<344x32xf32, #tpu.memory_space<vmem>>, vector<32x32xf32>
    %c32_92 = arith.constant 32 : index
    %c0_93 = arith.constant 0 : index
    %207 = vector.load %arg3[%c32_92, %c0_93] : memref<344x32xf32, #tpu.memory_space<vmem>>, vector<32x32xf32>
    %c64 = arith.constant 64 : index
    %c0_94 = arith.constant 0 : index
    %208 = vector.load %arg3[%c64, %c0_94] : memref<344x32xf32, #tpu.memory_space<vmem>>, vector<8x32xf32>
    %c72_95 = arith.constant 72 : index
    %c0_96 = arith.constant 0 : index
    %209 = vector.load %arg3[%c72_95, %c0_96] : memref<344x32xf32, #tpu.memory_space<vmem>>, vector<3x32xf32>
    %c80 = arith.constant 80 : index
    %c0_97 = arith.constant 0 : index
    %210 = vector.load %arg3[%c80, %c0_97] : memref<344x32xf32, #tpu.memory_space<vmem>>, vector<1x32xf32>
    %211 = vector.extract_strided_slice %209 {offsets = [0, 0], sizes = [1, 32], strides = [1, 1]} : vector<3x32xf32> to vector<1x32xf32>
    %212 = vector.extract_strided_slice %209 {offsets = [1, 0], sizes = [1, 32], strides = [1, 1]} : vector<3x32xf32> to vector<1x32xf32>
    %213 = vector.extract_strided_slice %209 {offsets = [2, 0], sizes = [1, 32], strides = [1, 1]} : vector<3x32xf32> to vector<1x32xf32>
    %cst_98 = arith.constant dense<0.000000e+00> : vector<16x32xf32>
    %214 = tpu.matmul %168, %206, %cst_98 {dimension_numbers = #tpu.dot_dimension_numbers<[1], [0], [0], [1], [0, 0, 1, 1], [], []>} : vector<16x32xf32>, vector<32x32xf32>, vector<16x32xf32> -> vector<16x32xf32>
    %cst_99 = arith.constant dense<0.000000e+00> : vector<1x16xf32>
    %215 = tpu.matmul %211, %214, %cst_99 {dimension_numbers = #tpu.dot_dimension_numbers<[1], [1], [0], [0], [0, 0, 1, 0], [], []>} : vector<1x32xf32>, vector<16x32xf32>, vector<1x16xf32> -> vector<1x16xf32>
    %cst_100 = arith.constant dense<0.000000e+00> : vector<32x1xf32>
    %216 = tpu.matmul %207, %212, %cst_100 {dimension_numbers = #tpu.dot_dimension_numbers<[1], [1], [0], [0], [0, 0, 1, 0], [], []>} : vector<32x32xf32>, vector<1x32xf32>, vector<32x1xf32> -> vector<32x1xf32>
    %cst_101 = arith.constant dense<0.000000e+00> : vector<16x1xf32>
    %217 = tpu.matmul %187, %216, %cst_101 {dimension_numbers = #tpu.dot_dimension_numbers<[1], [0], [0], [1], [0, 0, 1, 1], [], []>} : vector<16x32xf32>, vector<32x1xf32>, vector<16x1xf32> -> vector<16x1xf32>
    %cst_102 = arith.constant dense<0.000000e+00> : vector<8x1xf32>
    %218 = tpu.matmul %208, %213, %cst_102 {dimension_numbers = #tpu.dot_dimension_numbers<[1], [1], [0], [0], [0, 0, 1, 0], [], []>} : vector<8x32xf32>, vector<1x32xf32>, vector<8x1xf32> -> vector<8x1xf32>
    %cst_103 = arith.constant dense<0.000000e+00> : vector<40x1xf32>
    %219 = tpu.matmul %4, %218, %cst_103 {dimension_numbers = #tpu.dot_dimension_numbers<[1], [0], [0], [1], [0, 0, 1, 1], [], []>} : vector<40x8xf32>, vector<8x1xf32>, vector<40x1xf32> -> vector<40x1xf32>
    %220 = vector.broadcast %219 : vector<40x1xf32> to vector<40x16xf32>
    %221 = arith.mulf %220, %2 : vector<40x16xf32>
    %cst_104 = arith.constant dense<0.000000e+00> : vector<16x16xf32>
    %222 = tpu.matmul %1, %221, %cst_104 {dimension_numbers = #tpu.dot_dimension_numbers<[1], [0], [0], [1], [0, 0, 1, 1], [], []>} : vector<16x40xf32>, vector<40x16xf32>, vector<16x16xf32> -> vector<16x16xf32>
    %cst_105 = arith.constant dense<0.000000e+00> : vector<16x1xf32>
    %223 = tpu.matmul %3, %218, %cst_105 {dimension_numbers = #tpu.dot_dimension_numbers<[1], [0], [0], [1], [0, 0, 1, 1], [], []>} : vector<16x8xf32>, vector<8x1xf32>, vector<16x1xf32> -> vector<16x1xf32>
    %224 = tpu.iota {dimensions = array<i32: 0>} : vector<16x16xi32>
    %225 = tpu.iota {dimensions = array<i32: 1>} : vector<16x16xi32>
    %226 = arith.cmpi eq, %224, %225 : vector<16x16xi32>
    %227 = arith.extui %226 : vector<16x16xi1> to vector<16x16xi32>
    %228 = arith.sitofp %227 : vector<16x16xi32> to vector<16x16xf32>
    %cst_106 = arith.constant 1.000000e+00 : f32
    %229 = vector.broadcast %cst_106 : f32 to vector<16x16xf32>
    %230 = arith.subf %229, %228 : vector<16x16xf32>
    %231 = arith.mulf %222, %230 : vector<16x16xf32>
    %232 = vector.broadcast %223 : vector<16x1xf32> to vector<16x16xf32>
    %233 = arith.mulf %228, %232 : vector<16x16xf32>
    %234 = arith.addf %231, %233 : vector<16x16xf32>
    %235 = arith.maximumf %0, %228 : vector<16x16xf32>
    %236 = vector.broadcast %217 : vector<16x1xf32> to vector<16x16xf32>
    %237 = vector.broadcast %215 : vector<1x16xf32> to vector<16x16xf32>
    %238 = arith.addf %236, %237 : vector<16x16xf32>
    %239 = arith.addf %238, %234 : vector<16x16xf32>
    %cst_107 = arith.constant 0.000000e+00 : f32
    %240 = vector.broadcast %cst_107 : f32 to vector<16x16xf32>
    %241 = arith.cmpf ogt, %239, %240 : vector<16x16xf32>
    %cst_108 = arith.constant 2.000000e-01 : f32
    %242 = vector.broadcast %cst_108 : f32 to vector<16x16xf32>
    %243 = arith.mulf %242, %239 : vector<16x16xf32>
    %244 = arith.select %241, %239, %243 : vector<16x16xi1>, vector<16x16xf32>
    %cst_109 = arith.constant 0.000000e+00 : f32
    %245 = vector.broadcast %cst_109 : f32 to vector<16x16xf32>
    %246 = arith.cmpf ogt, %235, %245 : vector<16x16xf32>
    %cst_110 = arith.constant -1.000000e+30 : f32
    %247 = vector.broadcast %cst_110 : f32 to vector<16x16xf32>
    %248 = arith.select %246, %244, %247 : vector<16x16xi1>, vector<16x16xf32>
    %cst_111 = arith.constant dense<0xFF800000> : vector<16xf32>
    %249 = vector.multi_reduction <maximumf>, %248, %cst_111 [1] : vector<16x16xf32> to vector<16xf32>
    %250 = vector.shape_cast %249 : vector<16xf32> to vector<16x1xf32>
    %251 = vector.broadcast %250 : vector<16x1xf32> to vector<16x16xf32>
    %252 = arith.subf %248, %251 : vector<16x16xf32>
    %253 = math.exp %252 : vector<16x16xf32>
    %254 = arith.mulf %253, %235 : vector<16x16xf32>
    %cst_112 = arith.constant dense<0.000000e+00> : vector<16xf32>
    %255 = vector.multi_reduction <add>, %254, %cst_112 [1] : vector<16x16xf32> to vector<16xf32>
    %256 = vector.shape_cast %255 : vector<16xf32> to vector<16x1xf32>
    %cst_113 = arith.constant 1.000000e-16 : f32
    %257 = vector.broadcast %cst_113 : f32 to vector<16x1xf32>
    %258 = arith.addf %256, %257 : vector<16x1xf32>
    %259 = tpu.reciprocal %258 {approx = true} : vector<16x1xf32> -> vector<16x1xf32>
    %260 = vector.broadcast %259 : vector<16x1xf32> to vector<16x16xf32>
    %261 = arith.mulf %254, %260 : vector<16x16xf32>
    %cst_114 = arith.constant dense<0.000000e+00> : vector<16x32xf32>
    %262 = tpu.matmul %261, %214, %cst_114 {dimension_numbers = #tpu.dot_dimension_numbers<[1], [0], [0], [1], [0, 0, 1, 1], [], []>} : vector<16x16xf32>, vector<16x32xf32>, vector<16x32xf32> -> vector<16x32xf32>
    %263 = vector.broadcast %210 : vector<1x32xf32> to vector<16x32xf32>
    %264 = arith.addf %262, %263 : vector<16x32xf32>
    %c88_115 = arith.constant 88 : index
    %c0_116 = arith.constant 0 : index
    %265 = vector.load %arg3[%c88_115, %c0_116] : memref<344x32xf32, #tpu.memory_space<vmem>>, vector<32x32xf32>
    %c120 = arith.constant 120 : index
    %c0_117 = arith.constant 0 : index
    %266 = vector.load %arg3[%c120, %c0_117] : memref<344x32xf32, #tpu.memory_space<vmem>>, vector<32x32xf32>
    %c152_118 = arith.constant 152 : index
    %c0_119 = arith.constant 0 : index
    %267 = vector.load %arg3[%c152_118, %c0_119] : memref<344x32xf32, #tpu.memory_space<vmem>>, vector<8x32xf32>
    %c160_120 = arith.constant 160 : index
    %c0_121 = arith.constant 0 : index
    %268 = vector.load %arg3[%c160_120, %c0_121] : memref<344x32xf32, #tpu.memory_space<vmem>>, vector<3x32xf32>
    %c168 = arith.constant 168 : index
    %c0_122 = arith.constant 0 : index
    %269 = vector.load %arg3[%c168, %c0_122] : memref<344x32xf32, #tpu.memory_space<vmem>>, vector<1x32xf32>
    %270 = vector.extract_strided_slice %268 {offsets = [0, 0], sizes = [1, 32], strides = [1, 1]} : vector<3x32xf32> to vector<1x32xf32>
    %271 = vector.extract_strided_slice %268 {offsets = [1, 0], sizes = [1, 32], strides = [1, 1]} : vector<3x32xf32> to vector<1x32xf32>
    %272 = vector.extract_strided_slice %268 {offsets = [2, 0], sizes = [1, 32], strides = [1, 1]} : vector<3x32xf32> to vector<1x32xf32>
    %cst_123 = arith.constant dense<0.000000e+00> : vector<16x32xf32>
    %273 = tpu.matmul %187, %265, %cst_123 {dimension_numbers = #tpu.dot_dimension_numbers<[1], [0], [0], [1], [0, 0, 1, 1], [], []>} : vector<16x32xf32>, vector<32x32xf32>, vector<16x32xf32> -> vector<16x32xf32>
    %cst_124 = arith.constant dense<0.000000e+00> : vector<1x16xf32>
    %274 = tpu.matmul %270, %273, %cst_124 {dimension_numbers = #tpu.dot_dimension_numbers<[1], [1], [0], [0], [0, 0, 1, 0], [], []>} : vector<1x32xf32>, vector<16x32xf32>, vector<1x16xf32> -> vector<1x16xf32>
    %cst_125 = arith.constant dense<0.000000e+00> : vector<32x1xf32>
    %275 = tpu.matmul %266, %271, %cst_125 {dimension_numbers = #tpu.dot_dimension_numbers<[1], [1], [0], [0], [0, 0, 1, 0], [], []>} : vector<32x32xf32>, vector<1x32xf32>, vector<32x1xf32> -> vector<32x1xf32>
    %cst_126 = arith.constant dense<0.000000e+00> : vector<16x1xf32>
    %276 = tpu.matmul %168, %275, %cst_126 {dimension_numbers = #tpu.dot_dimension_numbers<[1], [0], [0], [1], [0, 0, 1, 1], [], []>} : vector<16x32xf32>, vector<32x1xf32>, vector<16x1xf32> -> vector<16x1xf32>
    %cst_127 = arith.constant dense<0.000000e+00> : vector<8x1xf32>
    %277 = tpu.matmul %267, %272, %cst_127 {dimension_numbers = #tpu.dot_dimension_numbers<[1], [1], [0], [0], [0, 0, 1, 0], [], []>} : vector<8x32xf32>, vector<1x32xf32>, vector<8x1xf32> -> vector<8x1xf32>
    %cst_128 = arith.constant dense<0.000000e+00> : vector<40x1xf32>
    %278 = tpu.matmul %9, %277, %cst_128 {dimension_numbers = #tpu.dot_dimension_numbers<[1], [0], [0], [1], [0, 0, 1, 1], [], []>} : vector<40x8xf32>, vector<8x1xf32>, vector<40x1xf32> -> vector<40x1xf32>
    %279 = vector.broadcast %278 : vector<40x1xf32> to vector<40x16xf32>
    %280 = arith.mulf %279, %7 : vector<40x16xf32>
    %cst_129 = arith.constant dense<0.000000e+00> : vector<16x16xf32>
    %281 = tpu.matmul %6, %280, %cst_129 {dimension_numbers = #tpu.dot_dimension_numbers<[1], [0], [0], [1], [0, 0, 1, 1], [], []>} : vector<16x40xf32>, vector<40x16xf32>, vector<16x16xf32> -> vector<16x16xf32>
    %cst_130 = arith.constant dense<0.000000e+00> : vector<16x1xf32>
    %282 = tpu.matmul %8, %277, %cst_130 {dimension_numbers = #tpu.dot_dimension_numbers<[1], [0], [0], [1], [0, 0, 1, 1], [], []>} : vector<16x8xf32>, vector<8x1xf32>, vector<16x1xf32> -> vector<16x1xf32>
    %283 = tpu.iota {dimensions = array<i32: 0>} : vector<16x16xi32>
    %284 = tpu.iota {dimensions = array<i32: 1>} : vector<16x16xi32>
    %285 = arith.cmpi eq, %283, %284 : vector<16x16xi32>
    %286 = arith.extui %285 : vector<16x16xi1> to vector<16x16xi32>
    %287 = arith.sitofp %286 : vector<16x16xi32> to vector<16x16xf32>
    %cst_131 = arith.constant 1.000000e+00 : f32
    %288 = vector.broadcast %cst_131 : f32 to vector<16x16xf32>
    %289 = arith.subf %288, %287 : vector<16x16xf32>
    %290 = arith.mulf %281, %289 : vector<16x16xf32>
    %291 = vector.broadcast %282 : vector<16x1xf32> to vector<16x16xf32>
    %292 = arith.mulf %287, %291 : vector<16x16xf32>
    %293 = arith.addf %290, %292 : vector<16x16xf32>
    %294 = arith.maximumf %5, %287 : vector<16x16xf32>
    %295 = vector.broadcast %276 : vector<16x1xf32> to vector<16x16xf32>
    %296 = vector.broadcast %274 : vector<1x16xf32> to vector<16x16xf32>
    %297 = arith.addf %295, %296 : vector<16x16xf32>
    %298 = arith.addf %297, %293 : vector<16x16xf32>
    %cst_132 = arith.constant 0.000000e+00 : f32
    %299 = vector.broadcast %cst_132 : f32 to vector<16x16xf32>
    %300 = arith.cmpf ogt, %298, %299 : vector<16x16xf32>
    %cst_133 = arith.constant 2.000000e-01 : f32
    %301 = vector.broadcast %cst_133 : f32 to vector<16x16xf32>
    %302 = arith.mulf %301, %298 : vector<16x16xf32>
    %303 = arith.select %300, %298, %302 : vector<16x16xi1>, vector<16x16xf32>
    %cst_134 = arith.constant 0.000000e+00 : f32
    %304 = vector.broadcast %cst_134 : f32 to vector<16x16xf32>
    %305 = arith.cmpf ogt, %294, %304 : vector<16x16xf32>
    %cst_135 = arith.constant -1.000000e+30 : f32
    %306 = vector.broadcast %cst_135 : f32 to vector<16x16xf32>
    %307 = arith.select %305, %303, %306 : vector<16x16xi1>, vector<16x16xf32>
    %cst_136 = arith.constant dense<0xFF800000> : vector<16xf32>
    %308 = vector.multi_reduction <maximumf>, %307, %cst_136 [1] : vector<16x16xf32> to vector<16xf32>
    %309 = vector.shape_cast %308 : vector<16xf32> to vector<16x1xf32>
    %310 = vector.broadcast %309 : vector<16x1xf32> to vector<16x16xf32>
    %311 = arith.subf %307, %310 : vector<16x16xf32>
    %312 = math.exp %311 : vector<16x16xf32>
    %313 = arith.mulf %312, %294 : vector<16x16xf32>
    %cst_137 = arith.constant dense<0.000000e+00> : vector<16xf32>
    %314 = vector.multi_reduction <add>, %313, %cst_137 [1] : vector<16x16xf32> to vector<16xf32>
    %315 = vector.shape_cast %314 : vector<16xf32> to vector<16x1xf32>
    %cst_138 = arith.constant 1.000000e-16 : f32
    %316 = vector.broadcast %cst_138 : f32 to vector<16x1xf32>
    %317 = arith.addf %315, %316 : vector<16x1xf32>
    %318 = tpu.reciprocal %317 {approx = true} : vector<16x1xf32> -> vector<16x1xf32>
    %319 = vector.broadcast %318 : vector<16x1xf32> to vector<16x16xf32>
    %320 = arith.mulf %313, %319 : vector<16x16xf32>
    %cst_139 = arith.constant dense<0.000000e+00> : vector<16x32xf32>
    %321 = tpu.matmul %320, %273, %cst_139 {dimension_numbers = #tpu.dot_dimension_numbers<[1], [0], [0], [1], [0, 0, 1, 1], [], []>} : vector<16x16xf32>, vector<16x32xf32>, vector<16x32xf32> -> vector<16x32xf32>
    %322 = vector.broadcast %269 : vector<1x32xf32> to vector<16x32xf32>
    %323 = arith.addf %321, %322 : vector<16x32xf32>
    %c176_140 = arith.constant 176 : index
    %c0_141 = arith.constant 0 : index
    %324 = vector.load %arg3[%c176_140, %c0_141] : memref<344x32xf32, #tpu.memory_space<vmem>>, vector<32x32xf32>
    %c208 = arith.constant 208 : index
    %c0_142 = arith.constant 0 : index
    %325 = vector.load %arg3[%c208, %c0_142] : memref<344x32xf32, #tpu.memory_space<vmem>>, vector<1x32xf32>
    %c216_143 = arith.constant 216 : index
    %c0_144 = arith.constant 0 : index
    %326 = vector.load %arg3[%c216_143, %c0_144] : memref<344x32xf32, #tpu.memory_space<vmem>>, vector<32x32xf32>
    %cst_145 = arith.constant dense<0.000000e+00> : vector<8x32xf32>
    %327 = tpu.matmul %10, %187, %cst_145 {dimension_numbers = #tpu.dot_dimension_numbers<[1], [0], [0], [1], [0, 0, 1, 1], [], []>} : vector<8x16xf32>, vector<16x32xf32>, vector<8x32xf32> -> vector<8x32xf32>
    %cst_146 = arith.constant dense<0.000000e+00> : vector<8x32xf32>
    %328 = tpu.matmul %327, %324, %cst_146 {dimension_numbers = #tpu.dot_dimension_numbers<[1], [0], [0], [1], [0, 0, 1, 1], [], []>} : vector<8x32xf32>, vector<32x32xf32>, vector<8x32xf32> -> vector<8x32xf32>
    %329 = vector.broadcast %325 : vector<1x32xf32> to vector<8x32xf32>
    %330 = arith.addf %328, %329 : vector<8x32xf32>
    %cst_147 = arith.constant dense<0.000000e+00> : vector<8x32xf32>
    %331 = tpu.matmul %205, %326, %cst_147 {dimension_numbers = #tpu.dot_dimension_numbers<[1], [0], [0], [1], [0, 0, 1, 1], [], []>} : vector<8x32xf32>, vector<32x32xf32>, vector<8x32xf32> -> vector<8x32xf32>
    %332 = arith.addf %330, %331 : vector<8x32xf32>
    %c248 = arith.constant 248 : index
    %c0_148 = arith.constant 0 : index
    %333 = vector.load %arg3[%c248, %c0_148] : memref<344x32xf32, #tpu.memory_space<vmem>>, vector<32x32xf32>
    %c280 = arith.constant 280 : index
    %c0_149 = arith.constant 0 : index
    %334 = vector.load %arg3[%c280, %c0_149] : memref<344x32xf32, #tpu.memory_space<vmem>>, vector<1x32xf32>
    %c288 = arith.constant 288 : index
    %c0_150 = arith.constant 0 : index
    %335 = vector.load %arg3[%c288, %c0_150] : memref<344x32xf32, #tpu.memory_space<vmem>>, vector<32x32xf32>
    %cst_151 = arith.constant dense<0.000000e+00> : vector<16x32xf32>
    %336 = tpu.matmul %11, %205, %cst_151 {dimension_numbers = #tpu.dot_dimension_numbers<[1], [0], [0], [1], [0, 0, 1, 1], [], []>} : vector<16x8xf32>, vector<8x32xf32>, vector<16x32xf32> -> vector<16x32xf32>
    %cst_152 = arith.constant dense<0.000000e+00> : vector<16x32xf32>
    %337 = tpu.matmul %336, %333, %cst_152 {dimension_numbers = #tpu.dot_dimension_numbers<[1], [0], [0], [1], [0, 0, 1, 1], [], []>} : vector<16x32xf32>, vector<32x32xf32>, vector<16x32xf32> -> vector<16x32xf32>
    %338 = vector.broadcast %334 : vector<1x32xf32> to vector<16x32xf32>
    %339 = arith.addf %337, %338 : vector<16x32xf32>
    %cst_153 = arith.constant dense<0.000000e+00> : vector<16x32xf32>
    %340 = tpu.matmul %187, %335, %cst_153 {dimension_numbers = #tpu.dot_dimension_numbers<[1], [0], [0], [1], [0, 0, 1, 1], [], []>} : vector<16x32xf32>, vector<32x32xf32>, vector<16x32xf32> -> vector<16x32xf32>
    %341 = arith.addf %339, %340 : vector<16x32xf32>
    %c320 = arith.constant 320 : index
    %c0_154 = arith.constant 0 : index
    %342 = vector.load %arg3[%c320, %c0_154] : memref<344x32xf32, #tpu.memory_space<vmem>>, vector<4x32xf32>
    %343 = vector.extract_strided_slice %342 {offsets = [0, 0], sizes = [1, 32], strides = [1, 1]} : vector<4x32xf32> to vector<1x32xf32>
    %344 = vector.extract_strided_slice %342 {offsets = [1, 0], sizes = [1, 32], strides = [1, 1]} : vector<4x32xf32> to vector<1x32xf32>
    %345 = vector.extract_strided_slice %342 {offsets = [2, 0], sizes = [1, 32], strides = [1, 1]} : vector<4x32xf32> to vector<1x32xf32>
    %346 = vector.extract_strided_slice %342 {offsets = [3, 0], sizes = [1, 32], strides = [1, 1]} : vector<4x32xf32> to vector<1x32xf32>
    %347 = vector.broadcast %345 : vector<1x32xf32> to vector<16x32xf32>
    %348 = arith.subf %323, %347 : vector<16x32xf32>
    %cst_155 = arith.constant 9.99999974E-6 : f32
    %349 = vector.broadcast %cst_155 : f32 to vector<1x32xf32>
    %350 = arith.addf %346, %349 : vector<1x32xf32>
    %351 = math.rsqrt %350 : vector<1x32xf32>
    %352 = vector.broadcast %351 : vector<1x32xf32> to vector<16x32xf32>
    %353 = arith.mulf %348, %352 : vector<16x32xf32>
    %354 = vector.broadcast %343 : vector<1x32xf32> to vector<16x32xf32>
    %355 = arith.mulf %353, %354 : vector<16x32xf32>
    %356 = vector.broadcast %344 : vector<1x32xf32> to vector<16x32xf32>
    %357 = arith.addf %355, %356 : vector<16x32xf32>
    %cst_156 = arith.constant 0.000000e+00 : f32
    %358 = vector.broadcast %cst_156 : f32 to vector<16x32xf32>
    %359 = arith.maximumf %357, %358 : vector<16x32xf32>
    %360 = arith.addf %264, %341 : vector<16x32xf32>
    %c328 = arith.constant 328 : index
    %c0_157 = arith.constant 0 : index
    %361 = vector.load %arg3[%c328, %c0_157] : memref<344x32xf32, #tpu.memory_space<vmem>>, vector<4x32xf32>
    %362 = vector.extract_strided_slice %361 {offsets = [0, 0], sizes = [1, 32], strides = [1, 1]} : vector<4x32xf32> to vector<1x32xf32>
    %363 = vector.extract_strided_slice %361 {offsets = [1, 0], sizes = [1, 32], strides = [1, 1]} : vector<4x32xf32> to vector<1x32xf32>
    %364 = vector.extract_strided_slice %361 {offsets = [2, 0], sizes = [1, 32], strides = [1, 1]} : vector<4x32xf32> to vector<1x32xf32>
    %365 = vector.extract_strided_slice %361 {offsets = [3, 0], sizes = [1, 32], strides = [1, 1]} : vector<4x32xf32> to vector<1x32xf32>
    %366 = vector.broadcast %364 : vector<1x32xf32> to vector<16x32xf32>
    %367 = arith.subf %360, %366 : vector<16x32xf32>
    %cst_158 = arith.constant 9.99999974E-6 : f32
    %368 = vector.broadcast %cst_158 : f32 to vector<1x32xf32>
    %369 = arith.addf %365, %368 : vector<1x32xf32>
    %370 = math.rsqrt %369 : vector<1x32xf32>
    %371 = vector.broadcast %370 : vector<1x32xf32> to vector<16x32xf32>
    %372 = arith.mulf %367, %371 : vector<16x32xf32>
    %373 = vector.broadcast %362 : vector<1x32xf32> to vector<16x32xf32>
    %374 = arith.mulf %372, %373 : vector<16x32xf32>
    %375 = vector.broadcast %363 : vector<1x32xf32> to vector<16x32xf32>
    %376 = arith.addf %374, %375 : vector<16x32xf32>
    %cst_159 = arith.constant 0.000000e+00 : f32
    %377 = vector.broadcast %cst_159 : f32 to vector<16x32xf32>
    %378 = arith.maximumf %376, %377 : vector<16x32xf32>
    %c336 = arith.constant 336 : index
    %c0_160 = arith.constant 0 : index
    %379 = vector.load %arg3[%c336, %c0_160] : memref<344x32xf32, #tpu.memory_space<vmem>>, vector<4x32xf32>
    %380 = vector.extract_strided_slice %379 {offsets = [0, 0], sizes = [1, 32], strides = [1, 1]} : vector<4x32xf32> to vector<1x32xf32>
    %381 = vector.extract_strided_slice %379 {offsets = [1, 0], sizes = [1, 32], strides = [1, 1]} : vector<4x32xf32> to vector<1x32xf32>
    %382 = vector.extract_strided_slice %379 {offsets = [2, 0], sizes = [1, 32], strides = [1, 1]} : vector<4x32xf32> to vector<1x32xf32>
    %383 = vector.extract_strided_slice %379 {offsets = [3, 0], sizes = [1, 32], strides = [1, 1]} : vector<4x32xf32> to vector<1x32xf32>
    %384 = vector.broadcast %382 : vector<1x32xf32> to vector<8x32xf32>
    %385 = arith.subf %332, %384 : vector<8x32xf32>
    %cst_161 = arith.constant 9.99999974E-6 : f32
    %386 = vector.broadcast %cst_161 : f32 to vector<1x32xf32>
    %387 = arith.addf %383, %386 : vector<1x32xf32>
    %388 = math.rsqrt %387 : vector<1x32xf32>
    %389 = vector.broadcast %388 : vector<1x32xf32> to vector<8x32xf32>
    %390 = arith.mulf %385, %389 : vector<8x32xf32>
    %391 = vector.broadcast %380 : vector<1x32xf32> to vector<8x32xf32>
    %392 = arith.mulf %390, %391 : vector<8x32xf32>
    %393 = vector.broadcast %381 : vector<1x32xf32> to vector<8x32xf32>
    %394 = arith.addf %392, %393 : vector<8x32xf32>
    %cst_162 = arith.constant 0.000000e+00 : f32
    %395 = vector.broadcast %cst_162 : f32 to vector<8x32xf32>
    %396 = arith.maximumf %394, %395 : vector<8x32xf32>
    %c0_163 = arith.constant 0 : index
    %c0_164 = arith.constant 0 : index
    %397 = vector.load %arg4[%c0_163, %c0_164] : memref<40x32xf32, #tpu.memory_space<vmem>>, vector<16x32xf32>
    tpu.vector_store %arg4[%c0_163, %c0_164], %359 {strides = array<i32>} : memref<40x32xf32, #tpu.memory_space<vmem>>, vector<16x32xf32>,
    %c16_165 = arith.constant 16 : index
    %c0_166 = arith.constant 0 : index
    %398 = vector.load %arg4[%c16_165, %c0_166] : memref<40x32xf32, #tpu.memory_space<vmem>>, vector<16x32xf32>
    tpu.vector_store %arg4[%c16_165, %c0_166], %378 {strides = array<i32>} : memref<40x32xf32, #tpu.memory_space<vmem>>, vector<16x32xf32>,
    %c32_167 = arith.constant 32 : index
    %c0_168 = arith.constant 0 : index
    %399 = vector.load %arg4[%c32_167, %c0_168] : memref<40x32xf32, #tpu.memory_space<vmem>>, vector<8x32xf32>
    tpu.vector_store %arg4[%c32_167, %c0_168], %396 {strides = array<i32>} : memref<40x32xf32, #tpu.memory_space<vmem>>, vector<8x32xf32>,
    return
  }
}

</mosaic_0001>

<bundles_post_ra>
// kernel: forward.1
= control target key start
LH: loop header
LB: loop body
LE: loop exit
PB: predicated region body
PF: predicated region fallthrough
CT: control target
= control target key end

     0   :  { %vm71_vm0 = vcmask 1043456   ;;  %vm98_vm1 = vcmask 261120   ;;  %vm134_vm2 = vcmask 254976   ;;  %vm64_vm3 = vcmask 97280   ;;  %s2859_s2 = inlined_call_operand.vmem [shape: f32[200,32], index: 2, kind: input, shape index: {}]   ;;  %s2860_s0 = inlined_call_operand.vmem [shape: f32[40,12], index: 0, kind: input, shape index: {}]   ;;  %s2861_s1 = inlined_call_operand.vmem [shape: f32[280,40], index: 1, kind: input, shape index: {}]   ;;  %s2862_s3 = inlined_call_operand.vmem [shape: f32[344,32], index: 3, kind: input, shape index: {}]   ;;  %s2863_s4 = inlined_call_operand.vmem [shape: f32[40,32], index: 4, kind: output, shape index: {}]  }
   0x1   :  { %v61_v0 = vld [vmem:[%s2859_s2 + $0x20] sm:$0xff]  ;;  %v2090_v1 = vld [vmem:[%s2859_s2 + $0x28] sm:$0x7]  ;;  %v59_v4 = vld [vmem:[%s2859_s2 + $0x10] sm:$0xff]  ;;  %vm177_vm4 = vcmask 64512   ;;  %vm145_vm5 = vcmask 1041408  }
   0x2   :  { %v172_v2 = vperm.slane %v2090_v1, 2  ;;  %v128_v3 = vperm.slane %v2090_v1, 1  ;;  %v58_v5 = vld [vmem:[%s2859_s2 + $0x8] sm:$0xf]  ;;  %v60_v8 = vld [vmem:[%s2859_s2 + $0x18] sm:$0x3] }
   0x3   :  { %1898 = vmatpush.msk.msra.mxu0 %vm71_vm0, %v58_v5  ;;  %v57_v13 = vld [vmem:[%s2859_s2] sm:$0xff]  ;;  %v2119_v15 = vld [vmem:[%s2860_s0 + $0x8] sm:$0xff]  ;;  %v2126_v16 = vld [vmem:[%s2861_s1 + $0x58] sm:$0xff]  ;;  %vm138_vm6 = vcmask 80896   ;;  %v2057_v28 = vmov 0   ;;  %vm255_vm7 = vcmask 326656  }
   0x4   :  { %v173_v6 = vmul.f32 %v172_v2, %v61_v0  ;;  %v129_v7 = vmul.f32 %v128_v3, %v59_v4  ;;  %v130_v11 = vmul.f32 %v128_v3, %v60_v8  ;;  %v2112_v14 = vld [vmem:[%s2860_s0] sm:$0xff]  ;;  %v2133_v18 = vld [vmem:[%s2861_s1 + $0x48] sm:$0xff]  ;;  %v2146_v22 = vld [vmem:[%s2860_s0 + $0x10] sm:$0xff]  ;;  %2003 = vset.pattern.permute.xlu0 %v2057_v28  ;;  %2002 = vset.pattern.permute.xlu2 %v2057_v28  ;;  %vm370_vm12 = vcmask 130048  }
   0x5   :  { %90 = vmatpush.msra.mxu0 %v57_v13  ;;  %v2140_v19 = vld [vmem:[%s2861_s1 + $0x60] sm:$0xff]  ;;  %v2155_v23 = vld [vmem:[%s2861_s1 + $0x68] sm:$0xff]  ;;  %v2160_v24 = vld [vmem:[%s2860_s0 + $0x18] sm:$0xff]  ;;  %2001 = vset.pattern.permute.xlu1 %v2057_v28  ;;  %vm495_vm15 = vcmask 257024  }
   0x6   :  { %v174_v9 = vsel %vm98_vm1, %v173_v6, 0.0  ;;  %v131_v10 = vsel %vm98_vm1, %v129_v7, 0.0  ;;  %v135_v12 = vsel %vm134_vm2, %v130_v11, 0.0  ;;  %1899 = vmatmul.msk.f32.vlgmr.msra.gmra.mxu0 %vm64_vm3, %v2112_v14  ;;  %v2169_v25 = vld [vmem:[%s2861_s1 + $0x70] sm:$0xff]  ;;  %v2176_v26 = vld [vmem:[%s2861_s1 + $0x78] sm:$0xff]  ;;  %v2204_v47 = vld [vmem:[%s2861_s1 + $0x40] sm:$0xff]  ;;  %v314_v7 = vlaneseq }
   0x7   :  { %175 = vadd.xlane.f32.xlu0 %v174_v9  ;;  %132 = vadd.xlane.f32.xlu1 %v131_v10  ;;  %v2183_v27 = vld [vmem:[%s2861_s1 + $0x50] sm:$0xff]  ;;  %v2194_v40 = vld [vmem:[%s2859_s2 + $0x60] sm:$0x7]  ;;  %v431_v42 = vld [vmem:[%s2859_s2 + $0x58] sm:$0xff] }
   0x8   :  { %v525_v41 = vperm.slane %v2194_v40, 2  ;;  %v2209_v48 = vld [vmem:[%s2861_s1 + $0x38] sm:$0xff]  ;;  %v2215_v51 = vld [vmem:[%s2861_s1 + $0x30] sm:$0xff]  ;;  %v2221_v54 = vld [vmem:[%s2861_s1 + $0x28] sm:$0xff]  ;;  %v315_v9 = vshrl.u32 %v314_v7, 7  ;;  %v318_v10 = vand.u32 127, %v314_v7 }
   0x9   :  { %v2227_v57 = vld [vmem:[%s2861_s1 + $0x20] sm:$0xff]  ;;  %v2234_v60 = vld [vmem:[%s2861_s1 + $0x10] sm:$0xff]  ;;  %v2241_v61 = vld [vmem:[%s2861_s1 + $0x18] sm:$0xff] }
   0xa   :  { %v526_v43 = vmul.f32 %v525_v41, %v431_v42  ;;  %v428_v62 = vld [vmem:[%s2859_s2 + $0x40] sm:$0x3]  ;;  %v427_v63 = vld [vmem:[%s2859_s2 + $0x38] sm:$0xff]  ;;  %v2278_v4 = vld [vmem:[%s2861_s1 + $0xd0] sm:$0xff]  ;;  %vm319_vm8 = vcmp.eq.s32.totalorder %v315_v9, %v318_v10 }
   0xb   :  { %v2259_v0 = vld [vmem:[%s2861_s1 + $0xd8] sm:$0xff]  ;;  %v2273_v3 = vld [vmem:[%s2861_s1 + $0xe0] sm:$0xff]  ;;  %v2287_v5 = vld [vmem:[%s2861_s1 + $0xe8] sm:$0xff] }
   0xc   :  { %v527_v44 = vsel %vm98_vm1, %v526_v43, 0.0  ;;  %v2294_v6 = vld [vmem:[%s2861_s1 + $0xf0] sm:$0xff] }
   0xe   :  { %1900 = vmatmul.msk.f32.gmra.mxu0 %vm64_vm3, %v2119_v15 }
   0xf   :  { %136 = vadd.xlane.f32.xlu0 %v135_v12  ;;  %v2058_v12 = vmov 0.0  }
  0x10   :  { %v2298_v13 = vsel %vm319_vm8, 1.0, %v2058_v12 }
  0x7a   :  { %v176_v17 = vpop.xlane.xlu0 %175  ;;  %v133_v21 = vpop.xlane.xlu1 %132 }
  0x7b   :  { %208 = vmatpush.msra.mxu3 %v176_v17  ;;  %306 = vmatpush.msrb.mxu0 %v176_v17 }
  0x7c   :  { %1907 = vmatmul.msk.f32.vlgmr.msra.gmra.mxu3 %vm177_vm4, %v2126_v16  ;;  %1914 = vmatmul.msk.f32.vlgmr.msrb.gmra.mxu0 %vm177_vm4, %v2133_v18 }
  0x7d   :  { %1998 = vmatpush.msrb.mxu3 %v176_v17 }
  0x82   :  { %v137_v20 = vpop.xlane.xlu0 %136 }
  0x83   :  { %1904 = vmatpush.msk.msra.mxu2 %vm145_vm5, %v137_v20  ;;  %v92_v29 = vpop.f32.mrf.mxu0  ;;  %v316_v20 = vadd.s32 8, %v315_v9 }
  0x84   :  { %1908 = vmatmul.msk.f32.gmra.mxu3 %vm177_vm4, %v2140_v19 }
  0x85   :  { %164 = vmatpush.msra.mxu2 %v133_v21  ;;  %v2301_v21 = vsub.f32 1.0, %v2298_v13  ;;  %vm320_vm9 = vcmp.eq.s32.totalorder %v316_v20, %v318_v10 }
  0x86   :  { %1905 = vmatmul.msk.f32.vlgmr.msra.gmra.mxu2 %vm138_vm6, %v2146_v22 }
  0x8b   :  { %v95_v30 = vpop.f32.mrf.mxu0 }
  0x8c   :  { %1909 = vmatmul.msk.f32.gmra.mxu3 %vm177_vm4, %v2155_v23  ;;  %1901 = vmatpush.xpose.msk.msra.mxu1 %vm98_vm1, %v95_v30 }
  0x8d   :  { %418 = vmatpush.msrb.mxu2 %v95_v30 }
  0x8e   :  { %1906 = vmatmul.msk.f32.gmra.mxu2 %vm138_vm6, %v2160_v24 }
  0x8f   :  { %419 = vmatpush.msrb.mxu2 %v92_v29 }
  0x90   :  { %1902 = vmatpush.xpose.msk.msra.mxu1 %vm98_vm1, %v92_v29  ;;  %v17_v29 = vld [vmem:[%s2861_s1] sm:$0xff] }
  0x93   :  { %1903 = vmatmul.msk.f32.vlgmr.msra.gmra.mxu1 %vm98_vm1, %v2090_v1  ;;  %v2264_v1 = vld [vmem:[%s2861_s1 + $0xc8] sm:$0xff] }
  0x94   :  { %1910 = vmatmul.msk.f32.gmra.mxu3 %vm177_vm4, %v2169_v25 }
  0x9c   :  { %1911 = vmatmul.msk.f32.gmra.mxu3 %vm177_vm4, %v2176_v26 }
  0xa4   :  { %1915 = vmatmul.msk.f32.vlgmr.msrb.gmra.mxu3 %vm177_vm4, %v2183_v27 }
  0xf9   :  { %v308_v38 = vpop.f32.mrf.mxu0 }
  0xff   :  { %v210_v31 = vpop.f32.mrf.mxu3 }
 0x107   :  { %v213_v32 = vpop.f32.mrf.mxu3 }
 0x108   :  { %232 = vperm.xlu0 %2003, %v213_v32  }
 0x109   :  { %v166_v33 = vpop.f32.mrf.mxu2 }
 0x10f   :  { %v216_v34 = vpop.f32.mrf.mxu3 }
 0x110   :  { %v125_v11 = vpop.f32.mrf.mxu1 }
 0x111   :  { %v169_v35 = vpop.f32.mrf.mxu2  ;;  %v355_v30 = vperm.slane %v125_v11, 0 }
 0x112   :  { %352 = vperm.xlu0 %2003, %v169_v35   ;;  %v2309_v35 = vmax.f32 %v17_v29, %v2298_v13 }
 0x114   :  { %vm366_vm11 = vcmp.gt.f32.partialorder %v2309_v35, 0.0 }
 0x117   :  { %v219_v36 = vpop.f32.mrf.mxu3 }
 0x118   :  { %242 = vperm.xlu2 %2002, %v219_v36   ;;  %v2311_v36 = vsel %vm320_vm9, 1.0, %v2058_v12  ;;  %vm822_vm9 = vcmask 1045504  }
 0x11f   :  { %v222_v37 = vpop.f32.mrf.mxu3 }
 0x120   :  { %237 = vperm.xlu2 %2002, %v216_v34   ;;  %247 = vperm.xlu1 %2001, %v222_v37  }
 0x127   :  { %v311_v39 = vpop.f32.mrf.mxu3 }
 0x128   :  { %227 = vperm.xlu2 %2002, %v210_v31   ;;  %331 = vperm.xlu1 %2001, %v308_v38   ;;  %v2314_v38 = vsub.f32 1.0, %v2311_v36 }
 0x130   :  { %347 = vperm.xlu1 %2001, %v166_v33  }
 0x138   :  { %336 = vperm.xlu1 %2001, %v311_v39  }
 0x151   :  { %528 = vadd.xlane.f32.xlu2 %v527_v44  ;;  %v18_v44 = vld [vmem:[%s2861_s1 + $0x8] sm:$0xff] }
 0x172   :  { %v243_v45 = vpop.permute.xlu2 %242 }
 0x173   :  { %v253_v52 = vmul.f32 %v243_v45, %v2209_v48 }
 0x17a   :  { %v238_v46 = vpop.permute.xlu2 %237  ;;  %v233_v53 = vpop.permute.xlu0 %232 }
 0x17b   :  { %v252_v55 = vmul.f32 %v238_v46, %v2215_v51  ;;  %v251_v58 = vmul.f32 %v233_v53, %v2221_v54 }
 0x182   :  { %v228_v56 = vpop.permute.xlu2 %227 }
 0x183   :  { %v250_v59 = vmul.f32 %v228_v56, %v2227_v57  ;;  %v2326_v56 = vmax.f32 %v18_v44, %v2311_v36  ;;  %v489_v44 = vperm.slane %v2194_v40, 1 }
 0x184   :  { %v353_v42 = vpop.permute.xlu0 %352 }
 0x185   :  { %vm367_vm14 = vcmp.gt.f32.partialorder %v2326_v56, 0.0 }
 0x192   :  { %v248_v49 = vpop.permute.xlu1 %247 }
 0x193   :  { %v254_v50 = vmul.f32 %v248_v49, %v2204_v47 }
 0x195   :  { %273 = vmatpush.msrb.mxu1 %v254_v50 }
 0x197   :  { %274 = vmatpush.msrb.mxu1 %v253_v52  ;;  %v357_v52 = vadd.f32 %v355_v30, %v353_v42 }
 0x199   :  { %275 = vmatpush.msrb.mxu1 %v252_v55 }
 0x19a   :  { %v332_v8 = vpop.permute.xlu1 %331 }
 0x19b   :  { %276 = vmatpush.msrb.mxu1 %v251_v58  ;;  %v339_v31 = vmul.f32 %v2298_v13, %v332_v8  ;;  %v2337_v8 = vld [vmem:[%s2861_s1 + $0xf8] sm:$0xff] }
 0x19d   :  { %277 = vmatpush.msrb.mxu1 %v250_v59 }
 0x19e   :  { %1912 = vmatmul.msk.f32.vlgmr.msrb.gmra.mxu1 %vm255_vm7, %v2234_v60 }
 0x19f   :  { %1920 = vmatpush.msk.msra.mxu1 %vm145_vm5, %v428_v62 }
 0x1a1   :  { %452 = vmatpush.msra.mxu1 %v427_v63 }
 0x1a2   :  { %v348_v17 = vpop.permute.xlu1 %347 }
 0x1a3   :  { %v356_v33 = vadd.f32 %v355_v30, %v348_v17 }
 0x1a6   :  { %1913 = vmatmul.msk.f32.gmra.mxu1 %vm255_vm7, %v2241_v61 }
 0x1aa   :  { %v337_v39 = vpop.permute.xlu1 %336 }
 0x1ab   :  { %v340_v45 = vmul.f32 %v2311_v36, %v337_v39 }
 0x1ae   :  { %1921 = vmatmul.msk.f32.vlgmr.msra.gmra.mxu1 %vm138_vm6, %v2146_v22 }
 0x1b6   :  { %1922 = vmatmul.msk.f32.gmra.mxu1 %vm138_vm6, %v2160_v24 }
 0x1c4   :  { %v529_v2 = vpop.xlane.xlu2 %528 }
 0x1c5   :  { %560 = vmatpush.msra.mxu3 %v529_v2  ;;  %657 = vmatpush.msrb.mxu1 %v529_v2 }
 0x1c6   :  { %1929 = vmatmul.msk.f32.vlgmr.msra.gmra.mxu3 %vm177_vm4, %v2259_v0  ;;  %1936 = vmatmul.msk.f32.vlgmr.msrb.gmra.mxu1 %vm177_vm4, %v2264_v1 }
 0x1ce   :  { %1930 = vmatmul.msk.f32.gmra.mxu3 %vm177_vm4, %v2273_v3  ;;  %1937 = vmatmul.msk.f32.gmra.mxu1 %vm177_vm4, %v2278_v4 }
 0x1d6   :  { %1931 = vmatmul.msk.f32.gmra.mxu3 %vm177_vm4, %v2287_v5 }
 0x1de   :  { %1932 = vmatmul.msk.f32.gmra.mxu3 %vm177_vm4, %v2294_v6 }
 0x1e6   :  { %1933 = vmatmul.msk.f32.gmra.mxu3 %vm177_vm4, %v2337_v8 }
 0x21b   :  { %v279_v28 = vpop.f32.mrf.mxu1 }
 0x21c   :  { %v327_v32 = vmul.f32 %v2301_v21, %v279_v28 }
 0x21e   :  { %v341_v34 = vadd.f32 %v339_v31, %v327_v32 }
 0x220   :  { %v358_v37 = vadd.f32 %v356_v33, %v341_v34 }
 0x222   :  { %vm360_vm10 = vcmp.gt.f32.partialorder %v358_v37, 0.0  ;;  %v362_v41 = vmul.f32 0.2, %v358_v37 }
 0x223   :  { %v282_v43 = vpop.f32.mrf.mxu1 }
 0x224   :  { %v328_v46 = vmul.f32 %v2314_v38, %v282_v43  ;;  %v364_v49 = vsel %vm360_vm10, %v358_v37, %v362_v41 }
 0x225   :  { %v368_v50 = vsel %vm366_vm11, %v364_v49, -1e+30 }
 0x226   :  { %v342_v53 = vadd.f32 %v340_v45, %v328_v46  ;;  %v371_v55 = vsel %vm370_vm12, %v368_v50, -inf  ;;  %v430_v45 = vld [vmem:[%s2859_s2 + $0x50] sm:$0xf] }
 0x227   :  { %372 = vmax.xlane.f32.xlu1 %v371_v55  ;;  %v491_v49 = vmul.f32 %v489_v44, %v430_v45 }
 0x228   :  { %v359_v58 = vadd.f32 %v357_v52, %v342_v53  ;;  %v429_v52 = vld [vmem:[%s2859_s2 + $0x48] sm:$0xff] }
 0x229   :  { %v490_v53 = vmul.f32 %v489_v44, %v429_v52  ;;  %v2408_v44 = vld [vmem:[%s2861_s1 + $0x98] sm:$0xff] }
 0x22a   :  { %vm361_vm13 = vcmp.gt.f32.partialorder %v359_v58, 0.0  ;;  %v363_v59 = vmul.f32 0.2, %v359_v58 }
 0x22b   :  { %v2332_v7 = vpop.f32.mrf.mxu1  ;;  %v492_v55 = vsel %vm98_vm1, %v490_v53, 0.0 }
 0x22c   :  { %v365_v62 = vsel %vm361_vm13, %v359_v58, %v363_v59 }
 0x22d   :  { %v369_v63 = vsel %vm367_vm14, %v365_v62, -1e+30 }
 0x22e   :  { %v374_v2 = vsel %vm370_vm12, %v369_v63, -inf }
 0x22f   :  { %375 = vmax.xlane.f32.xlu0 %v374_v2 }
 0x233   :  { %v457_v9 = vpop.f32.mrf.mxu1 }
 0x234   :  { %1923 = vmatpush.xpose.msk.msra.mxu0 %vm98_vm1, %v457_v9 }
 0x238   :  { %1924 = vmatpush.xpose.msk.msra.mxu0 %vm98_vm1, %v2332_v7 }
 0x23b   :  { %1925 = vmatmul.msk.f32.vlgmr.msra.gmra.mxu0 %vm98_vm1, %v2194_v40 }
 0x243   :  { %v659_v17 = vpop.f32.mrf.mxu1 }
 0x249   :  { %v562_v10 = vpop.f32.mrf.mxu3 }
 0x24b   :  { %v662_v28 = vpop.f32.mrf.mxu1 }
 0x251   :  { %v565_v11 = vpop.f32.mrf.mxu3 }
 0x259   :  { %v568_v12 = vpop.f32.mrf.mxu3 }
 0x25a   :  { %589 = vperm.xlu0 %2003, %v568_v12  }
 0x261   :  { %v571_v20 = vpop.f32.mrf.mxu3 }
 0x262   :  { %594 = vperm.xlu1 %2001, %v571_v20   ;;  %669 = vperm.xlu0 %2003, %v659_v17  }
 0x269   :  { %v574_v40 = vpop.f32.mrf.mxu3 }
 0x26a   :  { %579 = vperm.xlu1 %2001, %v562_v10  }
 0x272   :  { %674 = vperm.xlu1 %2001, %v662_v28  }
 0x29a   :  { %v373_v29 = vpop.xlane.xlu1 %372 }
 0x29b   :  { %v377_v30 = vsub.f32 %v368_v50, %v373_v29  ;;  %v496_v50 = vsel %vm495_vm15, %v491_v49, 0.0  ;;  %v2367_v29 = vld [vmem:[%s2861_s1 + $0xc0] sm:$0xff] }
 0x29d   :  { %v379_v31 = vmul.f32 1.442695, %v377_v30  ;;  %v2372_v30 = vld [vmem:[%s2861_s1 + $0xb8] sm:$0xff] }
 0x29f   :  { %2012 = vpow2.f32 %v379_v31 }
 0x2a2   :  { %v376_v32 = vpop.xlane.xlu0 %375 }
 0x2a3   :  { %v378_v33 = vsub.f32 %v369_v63, %v376_v32 }
 0x2a5   :  { %v2013_v34 = vpop.eup %2012  ;;  %v381_v37 = vmul.f32 1.442695, %v378_v33 }
 0x2a6   :  { %v383_v39 = vmul.f32 %v2013_v34, %v2309_v35  ;;  %v2387_v34 = vld [vmem:[%s2861_s1 + $0xa8] sm:$0xff] }
 0x2a7   :  { %2014 = vpow2.f32 %v381_v37  ;;  %v2392_v37 = vld [vmem:[%s2861_s1 + $0xa0] sm:$0xff] }
 0x2a8   :  { %v385_v41 = vsel %vm370_vm12, %v383_v39, 0.0 }
 0x2a9   :  { %386 = vadd.xlane.f32.xlu2 %v385_v41 }
 0x2ad   :  { %v2015_v42 = vpop.eup %2014 }
 0x2ae   :  { %v384_v43 = vmul.f32 %v2015_v42, %v2326_v56 }
 0x2b0   :  { %v388_v46 = vsel %vm370_vm12, %v384_v43, 0.0 }
 0x2b1   :  { %389 = vadd.xlane.f32.xlu2 %v388_v46 }
 0x2b8   :  { %v486_v52 = vpop.f32.mrf.mxu0 }
 0x2b9   :  { %497 = vadd.xlane.f32.xlu2 %v496_v50 }
 0x2c1   :  { %493 = vadd.xlane.f32.xlu2 %v492_v55 }
 0x2d9   :  { %599 = vperm.xlu2 %2002, %v574_v40   ;;  %v693_v40 = vperm.slane %v486_v52, 0 }
 0x2e1   :  { %584 = vperm.xlu2 %2002, %v565_v11   ;;  %v595_v11 = vpop.permute.xlu1 %594 }
 0x31c   :  { %v387_v58 = vpop.xlane.xlu2 %386 }
 0x31d   :  { %v391_v59 = vadd.f32 1e-16, %v387_v58 }
 0x31f   :  { %2016 = vrcp.f32 %v391_v59  ;;  %v33_v59 = vld [vmem:[%s2861_s1 + $0x80] sm:$0xff] }
 0x324   :  { %v390_v62 = vpop.xlane.xlu2 %389 }
 0x325   :  { %v2017_v63 = vpop.eup %2016  ;;  %v392_v2 = vadd.f32 1e-16, %v390_v62 }
 0x326   :  { %v395_v10 = vmul.f32 %v2017_v63, %v383_v39  ;;  %v580_v39 = vpop.permute.xlu1 %579 }
 0x327   :  { %2018 = vrcp.f32 %v392_v2 }
 0x328   :  { %1918 = vmatmul.msk.f32.vlgmr.msrb.gmra.mxu2 %vm370_vm12, %v395_v10 }
 0x32c   :  { %v498_v12 = vpop.xlane.xlu2 %497 }
 0x32d   :  { %v2019_v17 = vpop.eup %2018  ;;  %1926 = vmatpush.msk.msra.mxu2 %vm71_vm0, %v498_v12  ;;  %v2422_v12 = vmax.f32 %v33_v59, %v2298_v13 }
 0x32e   :  { %v396_v20 = vmul.f32 %v2019_v17, %v384_v43  ;;  %v2399_v43 = vld [vmem:[%s2861_s1 + $0x90] sm:$0xff] }
 0x32f   :  { %vm704_vm2 = vcmp.gt.f32.partialorder %v2422_v12, 0.0 }
 0x330   :  { %1919 = vmatmul.msk.f32.gmra.mxu2 %vm370_vm12, %v396_v20 }
 0x334   :  { %v494_v28 = vpop.xlane.xlu2 %493 }
 0x335   :  { %517 = vmatpush.msra.mxu2 %v494_v28 }
 0x337   :  { %755 = vmatpush.msrb.mxu2 %v457_v9  ;;  %v605_v9 = vmul.f32 %v595_v11, %v2372_v30 }
 0x338   :  { %1927 = vmatmul.msk.f32.vlgmr.msra.gmra.mxu2 %vm64_vm3, %v2112_v14  ;;  %v2378_v14 = vld [vmem:[%s2861_s1 + $0xb0] sm:$0xff] }
 0x339   :  { %756 = vmatpush.msrb.mxu2 %v2332_v7  ;;  %v590_v7 = vpop.permute.xlu0 %589 }
 0x33a   :  { %v604_v33 = vmul.f32 %v590_v7, %v2378_v14  ;;  %v675_v7 = vpop.permute.xlu1 %674 }
 0x33c   :  { %v600_v31 = vpop.permute.xlu2 %599 }
 0x33d   :  { %v606_v32 = vmul.f32 %v600_v31, %v2367_v29 }
 0x33f   :  { %624 = vmatpush.msrb.mxu0 %v606_v32 }
 0x340   :  { %1928 = vmatmul.msk.f32.gmra.mxu2 %vm64_vm3, %v2119_v15  ;;  %v602_v15 = vmul.f32 %v580_v39, %v2392_v37  ;;  %v678_v39 = vmul.f32 %v2311_v36, %v675_v7  ;;  %v50_v7 = vld [vmem:[%s2861_s1 + $0x108] sm:$0xff] }
 0x341   :  { %625 = vmatpush.msrb.mxu0 %v605_v9  ;;  %v670_v55 = vpop.permute.xlu0 %669 }
 0x342   :  { %v677_v62 = vmul.f32 %v2298_v13, %v670_v55 }
 0x343   :  { %626 = vmatpush.msrb.mxu0 %v604_v33  ;;  %v34_v33 = vld [vmem:[%s2861_s1 + $0x88] sm:$0xff] }
 0x344   :  { %v585_v41 = vpop.permute.xlu2 %584 }
 0x345   :  { %v603_v42 = vmul.f32 %v585_v41, %v2387_v34 }
 0x347   :  { %627 = vmatpush.msrb.mxu0 %v603_v42 }
 0x349   :  { %628 = vmatpush.msrb.mxu0 %v602_v15 }
 0x34a   :  { %1934 = vmatmul.msk.f32.vlgmr.msrb.gmra.mxu0 %vm255_vm7, %v2399_v43 }
 0x34b   :  { %785 = vmatpush.msra.mxu0 %v2160_v24 }
 0x34d   :  { %786 = vmatpush.msra.mxu0 %v2146_v22 }
 0x352   :  { %1935 = vmatmul.msk.f32.gmra.mxu0 %vm255_vm7, %v2408_v44 }
 0x3ab   :  { %v2412_v45 = vpop.f32.mrf.mxu2 }
 0x3b3   :  { %v2414_v46 = vpop.f32.mrf.mxu2 }
 0x3bb   :  { %v519_v49 = vpop.f32.mrf.mxu2 }
 0x3bc   :  { %685 = vperm.xlu2 %2002, %v519_v49   ;;  %v2434_v49 = vmax.f32 %v34_v33, %v2311_v36  ;;  %v2472_v33 = vld [vmem:[%s2861_s1 + $0x110] sm:$0xff] }
 0x3be   :  { %vm705_vm8 = vcmp.gt.f32.partialorder %v2434_v49, 0.0 }
 0x3c3   :  { %v522_v50 = vpop.f32.mrf.mxu2 }
 0x3c4   :  { %690 = vperm.xlu0 %2003, %v522_v50  }
 0x3c7   :  { %v630_v53 = vpop.f32.mrf.mxu0 }
 0x3c8   :  { %v665_v58 = vmul.f32 %v630_v53, %v2301_v21 }
 0x3ca   :  { %v679_v2 = vadd.f32 %v677_v62, %v665_v58 }
 0x3cf   :  { %v633_v32 = vpop.f32.mrf.mxu0 }
 0x3d0   :  { %v666_v9 = vmul.f32 %v633_v32, %v2314_v38 }
 0x3d2   :  { %v680_v42 = vadd.f32 %v678_v39, %v666_v9 }
 0x416   :  { %v686_v63 = vpop.permute.xlu2 %685 }
 0x417   :  { %v694_v10 = vadd.f32 %v693_v40, %v686_v63 }
 0x419   :  { %v696_v17 = vadd.f32 %v694_v10, %v679_v2 }
 0x41b   :  { %vm698_vm0 = vcmp.gt.f32.partialorder %v696_v17, 0.0  ;;  %v700_v20 = vmul.f32 0.2, %v696_v17 }
 0x41d   :  { %v702_v28 = vsel %vm698_vm0, %v696_v17, %v700_v20  ;;  %v2445_v17 = vld [vmem:[%s2861_s1 + $0x100] sm:$0xff] }
 0x41e   :  { %v706_v11 = vsel %vm704_vm2, %v702_v28, -1e+30  ;;  %v2450_v20 = vld [vmem:[%s2860_s0 + $0x20] sm:$0xff]  ;;  %1940 = vmatmul.msk.f32.vlgmr.msra.gmra.mxu0 %vm370_vm12, %v2445_v17 }
 0x41f   :  { %v708_v31 = vsel %vm370_vm12, %v706_v11, -inf  ;;  %v1024_v28 = vld [vmem:[%s2862_s3 + $0x40] sm:$0xff]  ;;  %872 = vmatpush.msrb.mxu0 %v2450_v20 }
 0x420   :  { %709 = vmax.xlane.f32.xlu2 %v708_v31 }
 0x426   :  { %1945 = vmatmul.msk.f32.vlgmr.msrb.gmra.mxu0 %vm177_vm4, %v50_v7 }
 0x42e   :  { %1946 = vmatmul.msk.f32.gmra.mxu0 %vm177_vm4, %v2472_v33 }
 0x436   :  { %v691_v41 = vpop.permute.xlu0 %690 }
 0x437   :  { %v695_v15 = vadd.f32 %v693_v40, %v691_v41 }
 0x439   :  { %v697_v50 = vadd.f32 %v695_v15, %v680_v42 }
 0x43b   :  { %vm699_vm3 = vcmp.gt.f32.partialorder %v697_v50, 0.0  ;;  %v701_v52 = vmul.f32 0.2, %v697_v50 }
 0x43d   :  { %v703_v53 = vsel %vm699_vm3, %v697_v50, %v701_v52 }
 0x43e   :  { %v707_v55 = vsel %vm705_vm8, %v703_v53, -1e+30 }
 0x43f   :  { %v711_v58 = vsel %vm370_vm12, %v707_v55, -inf }
 0x440   :  { %712 = vmax.xlane.f32.xlu1 %v711_v58 }
 0x493   :  { %v710_v59 = vpop.xlane.xlu2 %709 }
 0x494   :  { %v714_v62 = vsub.f32 %v706_v11, %v710_v59  ;;  %v2460_v11 = vld [vmem:[%s2862_s3 + $0x48] sm:$0x7] }
 0x495   :  { %v1131_v31 = vperm.slane %v2460_v11, 2  ;;  %v767_v59 = vld [vmem:[%s2859_s2 + $0x88] sm:$0x3f] }
 0x496   :  { %v716_v63 = vmul.f32 1.442695, %v714_v62  ;;  %1943 = vmatpush.msk.msra.mxu2 %vm822_vm9, %v767_v59 }
 0x497   :  { %v1132_v32 = vmul.f32 %v1131_v31, %v1024_v28  ;;  %v850_v28 = vld [vmem:[%s2859_s2 + $0xa8] sm:$0x3]  ;;  %v1019_v31 = vld [vmem:[%s2862_s3 + $0x18] sm:$0xff] }
 0x498   :  { %2020 = vpow2.f32 %v716_v63  ;;  %v765_v63 = vld [vmem:[%s2859_s2 + $0x78] sm:$0x3]  ;;  %1045 = vmatpush.msrb.mxu3 %v1019_v31 }
 0x499   :  { %v1133_v9 = vsel %vm98_vm1, %v1132_v32, 0.0  ;;  %1941 = vmatpush.msk.msra.mxu1 %vm145_vm5, %v765_v63  ;;  %v1018_v32 = vld [vmem:[%s2862_s3 + $0x10] sm:$0xff] }
 0x49a   :  { %1134 = vadd.xlane.f32.xlu1 %v1133_v9  ;;  %v847_v9 = vld [vmem:[%s2859_s2 + $0x90] sm:$0x3f]  ;;  %1046 = vmatpush.msrb.mxu3 %v1018_v32 }
 0x49e   :  { %v2021_v40 = vpop.eup %2020 }
 0x49f   :  { %v720_v2 = vmul.f32 %v2021_v40, %v2422_v12  ;;  %v788_v40 = vpop.f32.mrf.mxu0 }
 0x4a1   :  { %v722_v10 = vsel %vm370_vm12, %v720_v2, 0.0 }
 0x4a2   :  { %723 = vadd.xlane.f32.xlu0 %v722_v10  ;;  %v764_v10 = vld [vmem:[%s2859_s2 + $0x70] sm:$0xff] }
 0x4a3   :  { %813 = vmatpush.msra.mxu1 %v764_v10 }
 0x4a4   :  { %1942 = vmatmul.msk.f32.vlgmr.msra.gmra.mxu1 %vm138_vm6, %v788_v40 }
 0x4a5   :  { %1947 = vmatpush.msk.msrb.mxu1 %vm822_vm9, %v847_v9 }
 0x4a7   :  { %v874_v7 = vpop.f32.mrf.mxu0 }
 0x4b3   :  { %v713_v39 = vpop.xlane.xlu1 %712 }
 0x4b4   :  { %v715_v41 = vsub.f32 %v707_v55, %v713_v39  ;;  %v1017_v39 = vld [vmem:[%s2862_s3 + $0x8] sm:$0xff] }
 0x4b5   :  { %1047 = vmatpush.msrb.mxu3 %v1017_v39 }
 0x4b6   :  { %v718_v42 = vmul.f32 1.442695, %v715_v41 }
 0x4b8   :  { %2022 = vpow2.f32 %v718_v42  ;;  %v1016_v42 = vld [vmem:[%s2862_s3] sm:$0xff] }
 0x4b9   :  { %1048 = vmatpush.msrb.mxu3 %v1016_v42 }
 0x4be   :  { %v2023_v15 = vpop.eup %2022 }
 0x4bf   :  { %v721_v50 = vmul.f32 %v2023_v15, %v2434_v49 }
 0x4c1   :  { %v725_v52 = vsel %vm370_vm12, %v721_v50, 0.0 }
 0x4c2   :  { %726 = vadd.xlane.f32.xlu2 %v725_v52 }
 0x50d   :  { %v1135_v52 = vpop.xlane.xlu1 %1134 }
 0x50e   :  { %1236 = vmatpush.msra.mxu3 %v1135_v52 }
 0x515   :  { %v724_v53 = vpop.xlane.xlu0 %723 }
 0x516   :  { %v728_v58 = vadd.f32 1e-16, %v724_v53  ;;  %v877_v53 = vpop.f32.mrf.mxu0 }
 0x518   :  { %2024 = vrcp.f32 %v728_v58 }
 0x51e   :  { %v2025_v62 = vpop.eup %2024 }
 0x51f   :  { %v732_v55 = vmul.f32 %v2025_v62, %v720_v2  ;;  %v849_v2 = vld [vmem:[%s2859_s2 + $0xa0] sm:$0xff] }
 0x521   :  { %1938 = vmatmul.msk.f32.vlgmr.msrb.gmra.mxu2 %vm370_vm12, %v732_v55 }
 0x522   :  { %1950 = vmatpush.msk.msrb.mxu2 %vm145_vm5, %v850_v28  ;;  %vm818_vm5 = vcmask 48128  }
 0x523   :  { %1948 = vmatmul.msk.f32.vlgmr.msrb.gmra.mxu1 %vm818_vm5, %v874_v7 }
 0x524   :  { %931 = vmatpush.msrb.mxu2 %v849_v2 }
 0x52b   :  { %1949 = vmatmul.msk.f32.gmra.mxu1 %vm818_vm5, %v877_v53 }
 0x535   :  { %v727_v41 = vpop.xlane.xlu2 %726 }
 0x536   :  { %v729_v15 = vadd.f32 1e-16, %v727_v41  ;;  %v815_v41 = vpop.f32.mrf.mxu1 }
 0x538   :  { %2026 = vrcp.f32 %v729_v15 }
 0x53e   :  { %v2027_v58 = vpop.eup %2026 }
 0x53f   :  { %v733_v59 = vmul.f32 %v2027_v58, %v721_v50 }
 0x541   :  { %1939 = vmatmul.msk.f32.gmra.mxu2 %vm370_vm12, %v733_v59 }
 0x549   :  { %1944 = vmatmul.msk.f32.vlgmr.msra.gmra.mxu2 %vm818_vm5, %v2450_v20  ;;  %v941_v20 = vld [vmem:[%s2859_s2 + $0xb0] sm:$0xf] }
 0x54a   :  { %1151 = vmatpush.msra.mxu2 %v1135_v52  ;;  %v942_v63 = vperm.slane %v941_v20, 2  ;;  %v959_v2 = vperm.slane %v941_v20, 0  ;;  %v962_v32 = vperm.slane %v941_v20, 1  ;;  %v2006_v52 = vld [vmem:[%s2859_s2 + $0x80] ss:$0 sm:$0xff] }
 0x54b   :  { %v816_v59 = vadd.f32 %v2006_v52, %v815_v41 }
 0x551   :  { %1951 = vmatmul.msk.f32.vlgmr.msrb.gmra.mxu2 %vm138_vm6, %v2146_v22  ;;  %v945_v22 = vadd.f32 1e-05, %v941_v20 }
 0x553   :  { %2028 = vrsqrt.f32 %v945_v22 }
 0x559   :  { %1952 = vmatmul.msk.f32.gmra.mxu2 %vm138_vm6, %v2160_v24  ;;  %v2029_v24 = vpop.eup %2028  ;;  %vm952_vm6 = vweird.f32 %v945_v22 }
 0x55a   :  { %vm953_vm10 = vweird.f32 %v2029_v24 }
 0x55b   :  { %vm954_vm13 = vmor %vm952_vm6, %vm953_vm10 }
 0x561   :  { %1960 = vmatmul.msk.f32.vlgmr.msra.gmra.mxu2 %vm177_vm4, %v2126_v16  ;;  %v947_v16 = vmul.f32 %v2029_v24, %v945_v22 }
 0x563   :  { %v948_v50 = vmul.f32 %v2029_v24, %v947_v16 }
 0x565   :  { %v949_v62 = vmul.f32 0.5, %v948_v50 }
 0x569   :  { %1961 = vmatmul.msk.f32.gmra.mxu2 %vm177_vm4, %v2140_v19  ;;  %v950_v19 = vsub.f32 1.5, %v949_v62  ;;  %v2007_v62 = vld [vmem:[%s2859_s2 + $0x98] ss:$0 sm:$0xff] }
 0x571   :  { %1962 = vmatmul.msk.f32.gmra.mxu2 %vm177_vm4, %v2155_v23  ;;  %v951_v23 = vmul.f32 %v2029_v24, %v950_v19 }
 0x573   :  { %v955_v55 = vsel %vm954_vm13, %v2029_v24, %v951_v23  ;;  %v2004_v23 = vld [vmem:[%s2859_s2 + $0x30] ss:$0 sm:$0xff] }
 0x579   :  { %1963 = vmatmul.msk.f32.gmra.mxu2 %vm177_vm4, %v2169_v25  ;;  %v2005_v25 = vld [vmem:[%s2859_s2 + $0x68] ss:$0 sm:$0xff] }
 0x581   :  { %1964 = vmatmul.msk.f32.gmra.mxu2 %vm177_vm4, %v2176_v26  ;;  %v956_v26 = vperm.slane %v955_v55, 3 }
 0x5a0   :  { %v907_v24 = vpop.f32.mrf.mxu1 }
 0x5a4   :  { %v758_v40 = vpop.f32.mrf.mxu2 }
 0x5a5   :  { %v759_v10 = vadd.f32 %v2005_v25, %v758_v40 }
 0x5a7   :  { %v943_v28 = vsub.f32 %v759_v10, %v942_v63 }
 0x5a8   :  { %v910_v10 = vpop.f32.mrf.mxu1 }
 0x5a9   :  { %v957_v31 = vmul.f32 %v956_v26, %v943_v28  ;;  %v911_v28 = vadd.f32 %v2007_v62, %v910_v10  ;;  %v1020_v10 = vld [vmem:[%s2862_s3 + $0x20] sm:$0xff] }
 0x5ab   :  { %v960_v7 = vmul.f32 %v959_v2, %v957_v31  ;;  %v425_v31 = vadd.f32 %v2004_v23, %v2414_v46  ;;  %v1022_v46 = vld [vmem:[%s2862_s3 + $0x30] sm:$0xff] }
 0x5ad   :  { %v2539_v9 = vadd.f32 %v962_v32, %v960_v7 }
 0x5af   :  { %v965_v39 = vmax.f32 %v2539_v9, 0.0 }
 0x5b1   :  { %1953 = vmatmul.msk.f32.vlgmr.msrb.gmra.mxu3 %vm98_vm1, %v965_v39 }
 0x5c4   :  { %v761_v42 = vpop.f32.mrf.mxu2 }
 0x5c5   :  { %v762_v15 = vadd.f32 %v2005_v25, %v761_v42  ;;  %v908_v25 = vadd.f32 %v2007_v62, %v907_v24  ;;  %v1021_v24 = vld [vmem:[%s2862_s3 + $0x28] sm:$0xff] }
 0x5c7   :  { %v944_v53 = vsub.f32 %v762_v15, %v942_v63  ;;  %v422_v63 = vadd.f32 %v2004_v23, %v2412_v45 }
 0x5c9   :  { %v958_v58 = vmul.f32 %v956_v26, %v944_v53 }
 0x5cb   :  { %v961_v20 = vmul.f32 %v959_v2, %v958_v58 }
 0x5cc   :  { %v843_v22 = vpop.f32.mrf.mxu2 }
 0x5cd   :  { %v2548_v16 = vadd.f32 %v843_v22, %v816_v59  ;;  %v2550_v50 = vadd.f32 %v962_v32, %v961_v20  ;;  %v2583_v59 = vld [vmem:[%s2862_s3 + $0xa0] sm:$0x7] }
 0x5ce   :  { %v1442_v20 = vperm.slane %v2583_v59, 2 }
 0x5cf   :  { %v966_v19 = vmax.f32 %v2550_v50, 0.0  ;;  %v1732_v50 = vld [vmem:[%s2862_s3 + $0x120] sm:$0xff] }
 0x5d1   :  { %1954 = vmatmul.msk.f32.gmra.mxu3 %vm98_vm1, %v966_v19 }
 0x5d4   :  { %v933_v55 = vpop.f32.mrf.mxu2 }
 0x5d5   :  { %v939_v40 = vadd.f32 %v933_v55, %v908_v25  ;;  %v1023_v55 = vld [vmem:[%s2862_s3 + $0x38] sm:$0xff] }
 0x5d7   :  { %v2563_v26 = vadd.f32 %v939_v40, %v422_v63 }
 0x5d9   :  { %1967 = vmatmul.msk.f32.vlgmr.msra.gmra.mxu3 %vm177_vm4, %v2133_v18  ;;  %v1085_v18 = vperm.slane %v2460_v11, 1 }
 0x5db   :  { %v1088_v53 = vmul.f32 %v1085_v18, %v1022_v46  ;;  %v1087_v23 = vmul.f32 %v1085_v18, %v1021_v24  ;;  %v1089_v63 = vmul.f32 %v1085_v18, %v1023_v55 }
 0x5dc   :  { %v936_v2 = vpop.f32.mrf.mxu2 }
 0x5dd   :  { %v940_v32 = vadd.f32 %v936_v2, %v911_v28  ;;  %v1096_v58 = vsel %vm98_vm1, %v1088_v53, 0.0  ;;  %v1093_v25 = vsel %vm98_vm1, %v1087_v23, 0.0  ;;  %v1099_v40 = vsel %vm98_vm1, %v1089_v63, 0.0 }
 0x5de   :  { %v1086_v28 = vmul.f32 %v1085_v18, %v1020_v10 }
 0x5df   :  { %v2568_v7 = vadd.f32 %v940_v32, %v425_v31 }
 0x5e0   :  { %v1090_v2 = vsel %vm98_vm1, %v1086_v28, 0.0 }
 0x5e1   :  { %1968 = vmatmul.msk.f32.gmra.mxu3 %vm177_vm4, %v2183_v27  ;;  %v1347_v27 = vld [vmem:[%s2862_s3 + $0x98] sm:$0xff] }
 0x5e2   :  { %v1443_v22 = vmul.f32 %v1442_v20, %v1347_v27 }
 0x5e4   :  { %v1153_v41 = vpop.f32.mrf.mxu2  ;;  %v1444_v62 = vsel %vm98_vm1, %v1443_v22, 0.0 }
 0x5ec   :  { %v1156_v42 = vpop.f32.mrf.mxu2 }
 0x5f4   :  { %v1159_v45 = vpop.f32.mrf.mxu2 }
 0x5f5   :  { %1180 = vperm.xlu1 %2001, %v1159_v45  }
 0x5fc   :  { %v1162_v15 = vpop.f32.mrf.mxu2 }
 0x5fd   :  { %1185 = vperm.xlu2 %2002, %v1162_v15  }
 0x604   :  { %v1165_v52 = vpop.f32.mrf.mxu2 }
 0x605   :  { %1170 = vperm.xlu2 %2002, %v1153_v41   ;;  %1190 = vperm.xlu0 %2003, %v1165_v52   ;;  %v969_v41 = vld [vmem:[%s2859_s2 + $0xb8] sm:$0xf] }
 0x606   :  { %v973_v45 = vadd.f32 1e-05, %v969_v41 }
 0x608   :  { %2030 = vrsqrt.f32 %v973_v45  ;;  %vm980_vm15 = vweird.f32 %v973_v45 }
 0x60d   :  { %1175 = vperm.xlu0 %2003, %v1156_v42  }
 0x60e   :  { %v2031_v52 = vpop.eup %2030 }
 0x60f   :  { %v975_v18 = vmul.f32 %v2031_v52, %v973_v45  ;;  %vm981_vm0 = vweird.f32 %v2031_v52 }
 0x610   :  { %vm982_vm3 = vmor %vm980_vm15, %vm981_vm0 }
 0x611   :  { %v976_v46 = vmul.f32 %v2031_v52, %v975_v18 }
 0x613   :  { %v977_v53 = vmul.f32 0.5, %v976_v46 }
 0x615   :  { %v978_v20 = vsub.f32 1.5, %v977_v53 }
 0x61f   :  { %1097 = vadd.xlane.f32.xlu1 %v1096_v58 }
 0x627   :  { %1445 = vadd.xlane.f32.xlu1 %v1444_v62 }
 0x62e   :  { %1094 = vadd.xlane.f32.xlu2 %v1093_v25  ;;  %v970_v25 = vperm.slane %v969_v41, 2 }
 0x630   :  { %v971_v28 = vsub.f32 %v2563_v26, %v970_v25  ;;  %v1339_v26 = vld [vmem:[%s2862_s3 + $0x58] sm:$0xff] }
 0x634   :  { %v2599_v31 = vpop.f32.mrf.mxu3 }
 0x637   :  { %1100 = vadd.xlane.f32.xlu0 %v1099_v40 }
 0x63f   :  { %1091 = vadd.xlane.f32.xlu0 %v1090_v2 }
 0x654   :  { %v2601_v32 = vpop.f32.mrf.mxu3 }
 0x655   :  { %1955 = vmatpush.xpose.msk.msra.mxu0 %vm98_vm1, %v2601_v32 }
 0x657   :  { %v1186_v58 = vpop.permute.xlu2 %1185 }
 0x658   :  { %v1196_v62 = vmul.f32 %v1186_v58, %v2209_v48  ;;  %v1342_v48 = vld [vmem:[%s2862_s3 + $0x70] sm:$0xff] }
 0x659   :  { %1956 = vmatpush.xpose.msk.msra.mxu0 %vm98_vm1, %v2599_v31 }
 0x65c   :  { %v1238_v42 = vpop.f32.mrf.mxu3  ;;  %1957 = vmatmul.msk.f32.vlgmr.msra.gmra.mxu0 %vm98_vm1, %v2460_v11  ;;  %v979_v11 = vmul.f32 %v2031_v52, %v978_v20 }
 0x65d   :  { %1248 = vperm.xlu2 %2002, %v1238_v42   ;;  %v987_v42 = vperm.slane %v969_v41, 0 }
 0x65e   :  { %v983_v40 = vsel %vm982_vm3, %v2031_v52, %v979_v11 }
 0x65f   :  { %v1171_v55 = vpop.permute.xlu2 %1170  ;;  %v984_v2 = vperm.slane %v983_v40, 3 }
 0x664   :  { %v1241_v15 = vpop.f32.mrf.mxu3 }
 0x665   :  { %1253 = vperm.xlu1 %2001, %v1241_v15   ;;  %v990_v15 = vperm.slane %v969_v41, 1 }
 0x667   :  { %v1181_v24 = vpop.permute.xlu1 %1180 }
 0x668   :  { %v1195_v23 = vmul.f32 %v1181_v24, %v2215_v51  ;;  %v1341_v51 = vld [vmem:[%s2862_s3 + $0x68] sm:$0xff] }
 0x677   :  { %v1191_v27 = vpop.permute.xlu0 %1190 }
 0x678   :  { %v1197_v22 = vmul.f32 %v1191_v27, %v2204_v47  ;;  %v1193_v47 = vmul.f32 %v1171_v55, %v2227_v57  ;;  %v1340_v57 = vld [vmem:[%s2862_s3 + $0x60] sm:$0xff] }
 0x67a   :  { %1209 = vmatpush.msrb.mxu0 %v1197_v22 }
 0x67c   :  { %1210 = vmatpush.msrb.mxu0 %v1196_v62 }
 0x67e   :  { %1211 = vmatpush.msrb.mxu0 %v1195_v23 }
 0x67f   :  { %v1176_v63 = vpop.permute.xlu0 %1175 }
 0x680   :  { %v1194_v10 = vmul.f32 %v1176_v63, %v2221_v54  ;;  %v985_v54 = vmul.f32 %v984_v2, %v971_v28 }
 0x682   :  { %1212 = vmatpush.msrb.mxu0 %v1194_v10  ;;  %v988_v45 = vmul.f32 %v987_v42, %v985_v54 }
 0x684   :  { %1213 = vmatpush.msrb.mxu0 %v1193_v47  ;;  %v991_v52 = vadd.f32 %v990_v15, %v988_v45  ;;  %v1402_v45 = vperm.slane %v2583_v59, 1 }
 0x685   :  { %1965 = vmatmul.msk.f32.vlgmr.msrb.gmra.mxu0 %vm255_vm7, %v2234_v60  ;;  %v972_v60 = vsub.f32 %v2568_v7, %v970_v25 }
 0x686   :  { %1362 = vmatpush.msra.mxu0 %v1342_v48  ;;  %v2635_v46 = vmax.f32 %v991_v52, 0.0  ;;  %v1346_v52 = vld [vmem:[%s2862_s3 + $0x90] sm:$0xff] }
 0x687   :  { %v986_v18 = vmul.f32 %v984_v2, %v972_v60 }
 0x688   :  { %1363 = vmatpush.msra.mxu0 %v1341_v51 }
 0x689   :  { %v989_v53 = vmul.f32 %v987_v42, %v986_v18 }
 0x68a   :  { %1364 = vmatpush.msra.mxu0 %v1340_v57 }
 0x68b   :  { %v992_v27 = vadd.f32 %v990_v15, %v989_v53  ;;  %v1406_v53 = vmul.f32 %v1402_v45, %v1346_v52 }
 0x68c   :  { %1365 = vmatpush.msra.mxu0 %v1339_v26 }
 0x68d   :  { %1966 = vmatmul.msk.f32.gmra.mxu0 %vm255_vm7, %v2241_v61  ;;  %v2639_v20 = vmax.f32 %v992_v27, 0.0  ;;  %v1416_v27 = vsel %vm98_vm1, %v1406_v53, 0.0 }
 0x692   :  { %v1098_v58 = vpop.xlane.xlu1 %1097 }
 0x695   :  { %1971 = vmatmul.msk.f32.vlgmr.msra.gmra.mxu0 %vm98_vm1, %v2635_v46 }
 0x69a   :  { %v1446_v22 = vpop.xlane.xlu1 %1445 }
 0x69b   :  { %1547 = vmatpush.msrb.mxu2 %v1446_v22 }
 0x69c   :  { %1985 = vmatmul.msk.f32.vlgmr.msrb.gmra.mxu2 %vm177_vm4, %v2264_v1 }
 0x69d   :  { %1972 = vmatmul.msk.f32.gmra.mxu0 %vm98_vm1, %v2639_v20 }
 0x6a1   :  { %v1095_v7 = vpop.xlane.xlu2 %1094 }
 0x6a4   :  { %1986 = vmatmul.msk.f32.gmra.mxu2 %vm177_vm4, %v2278_v4 }
 0x6aa   :  { %v1101_v61 = vpop.xlane.xlu0 %1100 }
 0x6ab   :  { %1120 = vmatpush.msra.mxu1 %v1101_v61 }
 0x6ad   :  { %1121 = vmatpush.msra.mxu1 %v1098_v58 }
 0x6af   :  { %1122 = vmatpush.msra.mxu1 %v1095_v7 }
 0x6b2   :  { %v1092_v41 = vpop.xlane.xlu0 %1091 }
 0x6b3   :  { %1123 = vmatpush.msra.mxu1 %v1092_v41 }
 0x6b4   :  { %1958 = vmatmul.msk.f32.vlgmr.msra.gmra.mxu1 %vm98_vm1, %v2635_v46 }
 0x6b5   :  { %1330 = vmatpush.msrb.mxu1 %v2601_v32 }
 0x6b7   :  { %1331 = vmatpush.msrb.mxu1 %v2599_v31  ;;  %v1249_v23 = vpop.permute.xlu2 %1248 }
 0x6bc   :  { %1959 = vmatmul.msk.f32.gmra.mxu1 %vm98_vm1, %v2639_v20 }
 0x6d7   :  { %v1254_v47 = vpop.permute.xlu1 %1253 }
 0x6d9   :  { %v1082_v1 = vpop.f32.mrf.mxu0 }
 0x6da   :  { %v1270_v55 = vperm.slane %v1082_v1, 0 }
 0x702   :  { %v1215_v24 = vpop.f32.mrf.mxu0 }
 0x703   :  { %v1244_v25 = vmul.f32 %v1215_v24, %v2301_v21 }
 0x70a   :  { %v1218_v4 = vpop.f32.mrf.mxu0 }
 0x70b   :  { %v1245_v28 = vmul.f32 %v1218_v4, %v2314_v38 }
 0x712   :  { %v2653_v62 = vpop.f32.mrf.mxu0 }
 0x71a   :  { %v2655_v11 = vpop.f32.mrf.mxu0 }
 0x71b   :  { %1973 = vmatpush.xpose.msk.msrb.mxu3 %vm98_vm1, %v2655_v11 }
 0x71f   :  { %1974 = vmatpush.xpose.msk.msrb.mxu3 %vm98_vm1, %v2653_v62  ;;  %v1549_v24 = vpop.f32.mrf.mxu2 }
 0x722   :  { %1975 = vmatmul.msk.f32.vlgmr.msrb.gmra.mxu3 %vm98_vm1, %v2583_v59  ;;  %v1343_v59 = vld [vmem:[%s2862_s3 + $0x78] sm:$0xff] }
 0x723   :  { %1462 = vmatpush.msra.mxu3 %v1446_v22  ;;  %v1403_v22 = vmul.f32 %v1402_v45, %v1343_v59 }
 0x725   :  { %v1407_v61 = vsel %vm98_vm1, %v1403_v22, 0.0 }
 0x72a   :  { %1978 = vmatmul.msk.f32.vlgmr.msra.gmra.mxu3 %vm177_vm4, %v2259_v0  ;;  %v1256_v0 = vmul.f32 %v2298_v13, %v1249_v23 }
 0x72c   :  { %v1258_v40 = vadd.f32 %v1256_v0, %v1244_v25 }
 0x731   :  { %v1125_v31 = vpop.f32.mrf.mxu1 }
 0x732   :  { %1262 = vperm.xlu0 %2003, %v1125_v31   ;;  %1979 = vmatmul.msk.f32.gmra.mxu3 %vm177_vm4, %v2273_v3 }
 0x739   :  { %v1128_v32 = vpop.f32.mrf.mxu1 }
 0x73a   :  { %1267 = vperm.xlu0 %2003, %v1128_v32   ;;  %1980 = vmatmul.msk.f32.gmra.mxu3 %vm177_vm4, %v2287_v5 }
 0x742   :  { %1981 = vmatmul.msk.f32.gmra.mxu3 %vm177_vm4, %v2294_v6  ;;  %v1257_v6 = vmul.f32 %v2311_v36, %v1254_v47 }
 0x744   :  { %v1259_v51 = vadd.f32 %v1257_v6, %v1245_v28 }
 0x74a   :  { %1982 = vmatmul.msk.f32.gmra.mxu3 %vm177_vm4, %v2337_v8 }
 0x7a4   :  { %v1263_v63 = vpop.permute.xlu0 %1262 }
 0x7a5   :  { %v1271_v3 = vadd.f32 %v1270_v55, %v1263_v63  ;;  %v2687_v58 = vpop.f32.mrf.mxu3 }
 0x7a7   :  { %v1273_v10 = vadd.f32 %v1271_v3, %v1258_v40  ;;  %v1345_v40 = vld [vmem:[%s2862_s3 + $0x88] sm:$0xff] }
 0x7a9   :  { %vm1275_vm9 = vcmp.gt.f32.partialorder %v1273_v10, 0.0  ;;  %v1277_v5 = vmul.f32 0.2, %v1273_v10 }
 0x7ab   :  { %v1279_v2 = vsel %vm1275_vm9, %v1273_v10, %v1277_v5  ;;  %v1405_v10 = vmul.f32 %v1402_v45, %v1345_v40 }
 0x7ac   :  { %v1268_v48 = vpop.permute.xlu0 %1267  ;;  %v1281_v8 = vsel %vm366_vm11, %v1279_v2, -1e+30 }
 0x7ad   :  { %v1272_v54 = vadd.f32 %v1270_v55, %v1268_v48  ;;  %v1283_v42 = vsel %vm370_vm12, %v1281_v8, -inf  ;;  %v1464_v7 = vpop.f32.mrf.mxu3  ;;  %v1413_v5 = vsel %vm98_vm1, %v1405_v10, 0.0 }
 0x7ae   :  { %1284 = vmax.xlane.f32.xlu2 %v1283_v42  ;;  %v1552_v42 = vpop.f32.mrf.mxu2 }
 0x7af   :  { %v1274_v57 = vadd.f32 %v1272_v54, %v1259_v51 }
 0x7b1   :  { %vm1276_vm5 = vcmp.gt.f32.partialorder %v1274_v57, 0.0  ;;  %v1278_v26 = vmul.f32 0.2, %v1274_v57 }
 0x7b3   :  { %v1280_v15 = vsel %vm1276_vm5, %v1274_v57, %v1278_v26 }
 0x7b4   :  { %v1282_v60 = vsel %vm367_vm14, %v1280_v15, -1e+30 }
 0x7b5   :  { %v1286_v18 = vsel %vm370_vm12, %v1282_v60, -inf  ;;  %v1467_v41 = vpop.f32.mrf.mxu3 }
 0x7b6   :  { %1287 = vmax.xlane.f32.xlu0 %v1286_v18 }
 0x7bd   :  { %v1470_v1 = vpop.f32.mrf.mxu3 }
 0x7be   :  { %1417 = vadd.xlane.f32.xlu0 %v1416_v27 }
 0x7c5   :  { %v1473_v51 = vpop.f32.mrf.mxu3 }
 0x7c6   :  { %1408 = vadd.xlane.f32.xlu0 %v1407_v61 }
 0x7cd   :  { %v1476_v54 = vpop.f32.mrf.mxu3 }
 0x7da   :  { %1491 = vperm.xlu0 %2003, %v1470_v1  }
 0x7e2   :  { %1559 = vperm.xlu0 %2003, %v1549_v24  }
 0x821   :  { %v1285_v4 = vpop.xlane.xlu2 %1284 }
 0x822   :  { %v1289_v31 = vsub.f32 %v1281_v8, %v1285_v4 }
 0x824   :  { %v1291_v32 = vmul.f32 1.442695, %v1289_v31 }
 0x826   :  { %2032 = vpow2.f32 %v1291_v32 }
 0x829   :  { %v1288_v23 = vpop.xlane.xlu0 %1287 }
 0x82a   :  { %v1290_v25 = vsub.f32 %v1282_v60, %v1288_v23 }
 0x82c   :  { %v2033_v0 = vpop.eup %2032  ;;  %v1293_v55 = vmul.f32 1.442695, %v1290_v25 }
 0x82d   :  { %v1295_v63 = vmul.f32 %v2033_v0, %v2309_v35  ;;  %v1344_v35 = vld [vmem:[%s2862_s3 + $0x80] sm:$0xff] }
 0x82e   :  { %2034 = vpow2.f32 %v1293_v55  ;;  %v1404_v48 = vmul.f32 %v1402_v45, %v1344_v35 }
 0x82f   :  { %v1297_v3 = vsel %vm370_vm12, %v1295_v63, 0.0 }
 0x830   :  { %1298 = vadd.xlane.f32.xlu1 %v1297_v3  ;;  %v1410_v8 = vsel %vm98_vm1, %v1404_v48, 0.0  ;;  %v1653_v48 = vld [vmem:[%s2862_s3 + $0xc8] sm:$0xff] }
 0x831   :  { %v1418_v47 = vpop.xlane.xlu0 %1417  ;;  %1695 = vmatpush.msra.mxu2 %v1653_v48 }
 0x832   :  { %1431 = vmatpush.msra.mxu1 %v1418_v47 }
 0x834   :  { %v2035_v28 = vpop.eup %2034 }
 0x835   :  { %v1296_v6 = vmul.f32 %v2035_v28, %v2326_v56  ;;  %v995_v56 = vld [vmem:[%s2859_s2 + $0xc0] sm:$0xf] }
 0x836   :  { %v998_v57 = vadd.f32 1e-05, %v995_v56  ;;  %v996_v59 = vperm.slane %v995_v56, 2  ;;  %v1011_v23 = vperm.slane %v995_v56, 0  ;;  %v1013_v10 = vperm.slane %v995_v56, 1 }
 0x837   :  { %v1300_v2 = vsel %vm370_vm12, %v1296_v6, 0.0 }
 0x838   :  { %1414 = vadd.xlane.f32.xlu1 %v1413_v5  ;;  %1301 = vadd.xlane.f32.xlu2 %v1300_v2  ;;  %2036 = vrsqrt.f32 %v998_v57  ;;  %vm1005_vm11 = vweird.f32 %v998_v57  ;;  %v997_v4 = vsub.f32 %v2548_v16, %v996_v59 }
 0x839   :  { %v1409_v55 = vpop.xlane.xlu0 %1408 }
 0x83e   :  { %v2037_v26 = vpop.eup %2036 }
 0x83f   :  { %v1000_v15 = vmul.f32 %v2037_v26, %v998_v57  ;;  %vm1006_vm14 = vweird.f32 %v2037_v26 }
 0x840   :  { %1411 = vadd.xlane.f32.xlu2 %v1410_v8  ;;  %vm1007_vm6 = vmor %vm1005_vm11, %vm1006_vm14  ;;  %v1652_v8 = vld [vmem:[%s2862_s3 + $0xc0] sm:$0xff] }
 0x841   :  { %v1001_v45 = vmul.f32 %v2037_v26, %v1000_v15  ;;  %1696 = vmatpush.msra.mxu2 %v1652_v8 }
 0x843   :  { %v1002_v60 = vmul.f32 0.5, %v1001_v45  ;;  %v1581_v45 = vperm.slane %v2687_v58, 0 }
 0x845   :  { %v1003_v52 = vsub.f32 1.5, %v1002_v60 }
 0x847   :  { %v1004_v27 = vmul.f32 %v2037_v26, %v1003_v52 }
 0x849   :  { %v1008_v22 = vsel %vm1007_vm6, %v2037_v26, %v1004_v27 }
 0x84a   :  { %v1009_v31 = vperm.slane %v1008_v22, 3 }
 0x84c   :  { %v1010_v32 = vmul.f32 %v1009_v31, %v997_v4 }
 0x84e   :  { %v1012_v3 = vmul.f32 %v1011_v23, %v1010_v32  ;;  %v1868_v32 = vld [vmem:[%s2862_s3 + $0x150] sm:$0xf] }
 0x850   :  { %v1014_v16 = vadd.f32 %v1013_v10, %v1012_v3 }
 0x851   :  { %1501 = vperm.xlu1 %2001, %v1476_v54  }
 0x852   :  { %v1015_v47 = vmax.f32 %v1014_v16, 0.0 }
 0x858   :  { %1496 = vperm.xlu2 %2002, %v1473_v51   ;;  %v1650_v51 = vld [vmem:[%s2862_s3 + $0xb0] sm:$0xff] }
 0x859   :  { %1481 = vperm.xlu1 %2001, %v1464_v7  }
 0x860   :  { %1486 = vperm.xlu2 %2002, %v1467_v41  }
 0x861   :  { %1564 = vperm.xlu1 %2001, %v1552_v42  }
 0x8a3   :  { %v1299_v18 = vpop.xlane.xlu1 %1298 }
 0x8a4   :  { %v1303_v53 = vadd.f32 1e-16, %v1299_v18 }
 0x8a6   :  { %2038 = vrcp.f32 %v1303_v53 }
 0x8ab   :  { %v1302_v61 = vpop.xlane.xlu2 %1301  ;;  %v1415_v7 = vpop.xlane.xlu1 %1414 }
 0x8ac   :  { %v2039_v41 = vpop.eup %2038  ;;  %v1304_v1 = vadd.f32 1e-16, %v1302_v61  ;;  %1432 = vmatpush.msra.mxu1 %v1415_v7 }
 0x8ad   :  { %v1307_v24 = vmul.f32 %v2039_v41, %v1295_v63 }
 0x8ae   :  { %2040 = vrcp.f32 %v1304_v1 }
 0x8af   :  { %1969 = vmatmul.msk.f32.vlgmr.msrb.gmra.mxu1 %vm370_vm12, %v1307_v24 }
 0x8b3   :  { %v1412_v25 = vpop.xlane.xlu2 %1411 }
 0x8b4   :  { %v2041_v0 = vpop.eup %2040  ;;  %1433 = vmatpush.msra.mxu1 %v1412_v25 }
 0x8b5   :  { %v1308_v40 = vmul.f32 %v2041_v0, %v1296_v6  ;;  %v1492_v6 = vpop.permute.xlu0 %1491  ;;  %v1871_v0 = vadd.f32 1e-05, %v1868_v32 }
 0x8b6   :  { %1434 = vmatpush.msra.mxu1 %v1409_v55 }
 0x8b7   :  { %1970 = vmatmul.msk.f32.gmra.mxu1 %vm370_vm12, %v1308_v40  ;;  %2042 = vrsqrt.f32 %v1871_v0 }
 0x8b8   :  { %1641 = vmatpush.msrb.mxu1 %v2655_v11 }
 0x8ba   :  { %1642 = vmatpush.msrb.mxu1 %v2653_v62  ;;  %v1506_v62 = vmul.f32 %v1492_v6, %v2378_v14  ;;  %v1656_v14 = vld [vmem:[%s2862_s3 + $0xe0] sm:$0xff]  ;;  %v1869_v6 = vperm.slane %v1868_v32, 2 }
 0x8bb   :  { %v1497_v63 = vpop.permute.xlu2 %1496 }
 0x8bc   :  { %v1507_v35 = vmul.f32 %v1497_v63, %v2372_v30  ;;  %v1657_v30 = vld [vmem:[%s2862_s3 + $0xe8] sm:$0xff]  ;;  %v2009_v63 = vld [vmem:[%s2862_s3 + $0xd0] ss:$0 sm:$0xff] }
 0x8bd   :  { %v1560_v26 = vpop.permute.xlu0 %1559 }
 0x8be   :  { %v1567_v60 = vmul.f32 %v2298_v13, %v1560_v26 }
 0x8bf   :  { %1976 = vmatmul.msk.f32.vlgmr.msra.gmra.mxu1 %vm98_vm1, %v965_v39 }
 0x8c0   :  { %1751 = vmatpush.msra.mxu1 %v1015_v47 }
 0x8c3   :  { %v1502_v28 = vpop.permute.xlu1 %1501  ;;  %v1487_v2 = vpop.permute.xlu2 %1486 }
 0x8c4   :  { %v1508_v5 = vmul.f32 %v1502_v28, %v2367_v29  ;;  %v1505_v9 = vmul.f32 %v1487_v2, %v2387_v34  ;;  %v1658_v29 = vld [vmem:[%s2862_s3 + $0xf0] sm:$0xff]  ;;  %v1655_v34 = vld [vmem:[%s2862_s3 + $0xd8] sm:$0xff] }
 0x8c6   :  { %1520 = vmatpush.msrb.mxu0 %v1508_v5 }
 0x8c7   :  { %1977 = vmatmul.msk.f32.gmra.mxu1 %vm98_vm1, %v966_v19 }
 0x8c8   :  { %1521 = vmatpush.msrb.mxu0 %v1507_v35 }
 0x8ca   :  { %1522 = vmatpush.msrb.mxu0 %v1506_v62 }
 0x8cb   :  { %v1482_v39 = vpop.permute.xlu1 %1481 }
 0x8cc   :  { %v1504_v11 = vmul.f32 %v1482_v39, %v2392_v37  ;;  %1523 = vmatpush.msrb.mxu0 %v1505_v9  ;;  %v1735_v37 = vld [vmem:[%s2862_s3 + $0x138] sm:$0xff]  ;;  %v1884_v39 = vperm.slane %v1868_v32, 0 }
 0x8ce   :  { %1524 = vmatpush.msrb.mxu0 %v1504_v11 }
 0x8cf   :  { %1983 = vmatmul.msk.f32.vlgmr.msrb.gmra.mxu0 %vm255_vm7, %v2399_v43  ;;  %v1734_v43 = vld [vmem:[%s2862_s3 + $0x130] sm:$0xff] }
 0x8d0   :  { %1673 = vmatpush.msra.mxu0 %v2639_v20 }
 0x8d2   :  { %1674 = vmatpush.msra.mxu0 %v2635_v46 }
 0x8d3   :  { %v1565_v41 = vpop.permute.xlu1 %1564 }
 0x8d4   :  { %1718 = vmatpush.msrb.mxu0 %v1658_v29  ;;  %v1568_v58 = vmul.f32 %v2311_v36, %v1565_v41  ;;  %v2043_v36 = vpop.eup %2042  ;;  %v1886_v29 = vperm.slane %v1868_v32, 1 }
 0x8d5   :  { %vm1879_vm13 = vweird.f32 %v2043_v36 }
 0x8d6   :  { %1719 = vmatpush.msrb.mxu0 %v1657_v30 }
 0x8d7   :  { %1984 = vmatmul.msk.f32.gmra.mxu0 %vm255_vm7, %v2408_v44  ;;  %v1733_v44 = vld [vmem:[%s2862_s3 + $0x128] sm:$0xff] }
 0x8d8   :  { %1720 = vmatpush.msrb.mxu0 %v1656_v14 }
 0x8da   :  { %1721 = vmatpush.msrb.mxu0 %v1655_v34 }
 0x8df   :  { %1989 = vmatmul.msk.f32.vlgmr.msra.gmra.mxu0 %vm370_vm12, %v2445_v17 }
 0x8e0   :  { %1801 = vmatpush.msra.mxu0 %v1735_v37 }
 0x8e2   :  { %1802 = vmatpush.msra.mxu0 %v1734_v43 }
 0x8e4   :  { %1803 = vmatpush.msra.mxu0 %v1733_v44 }
 0x8e6   :  { %1804 = vmatpush.msra.mxu0 %v1732_v50 }
 0x8e7   :  { %1991 = vmatmul.msk.f32.vlgmr.msrb.gmra.mxu0 %vm98_vm1, %v1015_v47 }
 0x8ef   :  { %1996 = vmatmul.msk.f32.vlgmr.msra.gmra.mxu0 %vm98_vm1, %v2635_v46  ;;  %v1651_v46 = vld [vmem:[%s2862_s3 + $0xb8] sm:$0xff] }
 0x8f0   :  { %1697 = vmatpush.msra.mxu2 %v1651_v46 }
 0x8f2   :  { %1698 = vmatpush.msra.mxu2 %v1650_v51 }
 0x8f7   :  { %1997 = vmatmul.msk.f32.gmra.mxu0 %vm98_vm1, %v2639_v20 }
 0x92c   :  { %v2762_v17 = vpop.f32.mrf.mxu1 }
 0x934   :  { %v2764_v19 = vpop.f32.mrf.mxu1 }
 0x93c   :  { %v1436_v20 = vpop.f32.mrf.mxu1 }
 0x93d   :  { %1573 = vperm.xlu2 %2002, %v1436_v20  }
 0x944   :  { %v1439_v54 = vpop.f32.mrf.mxu1 }
 0x945   :  { %1578 = vperm.xlu0 %2003, %v1439_v54  }
 0x94c   :  { %v1526_v42 = vpop.f32.mrf.mxu0 }
 0x94d   :  { %v1555_v15 = vmul.f32 %v1526_v42, %v2301_v21 }
 0x94f   :  { %v1569_v18 = vadd.f32 %v1567_v60, %v1555_v15 }
 0x954   :  { %v1529_v56 = vpop.f32.mrf.mxu0 }
 0x955   :  { %v1556_v21 = vmul.f32 %v1529_v56, %v2314_v38  ;;  %v1873_v38 = vmul.f32 %v2043_v36, %v1871_v0 }
 0x957   :  { %v1570_v13 = vadd.f32 %v1568_v58, %v1556_v21  ;;  %v1874_v40 = vmul.f32 %v2043_v36, %v1873_v38  ;;  %v2010_v58 = vld [vmem:[%s2862_s3 + $0xa8] ss:$0 sm:$0xff] }
 0x959   :  { %v1875_v3 = vmul.f32 0.5, %v1874_v40  ;;  %v1727_v40 = vld [vmem:[%s2862_s3 + $0xf8] sm:$0xff] }
 0x95b   :  { %v1876_v10 = vsub.f32 1.5, %v1875_v3 }
 0x95c   :  { %v1676_v57 = vpop.f32.mrf.mxu0 }
 0x95d   :  { %1990 = vmatmul.msk.f32.vlgmr.msra.gmra.mxu2 %vm98_vm1, %v1676_v57  ;;  %v1877_v16 = vmul.f32 %v2043_v36, %v1876_v10 }
 0x964   :  { %v1723_v35 = vpop.f32.mrf.mxu0 }
 0x997   :  { %v1574_v52 = vpop.permute.xlu2 %1573 }
 0x998   :  { %v1582_v53 = vadd.f32 %v1581_v45, %v1574_v52 }
 0x99a   :  { %v1584_v27 = vadd.f32 %v1582_v53, %v1569_v18  ;;  %v1814_v53 = vld [vmem:[%s2862_s3 + $0x140] sm:$0xf] }
 0x99c   :  { %vm1586_vm7 = vcmp.gt.f32.partialorder %v1584_v27, 0.0  ;;  %v1588_v59 = vmul.f32 0.2, %v1584_v27 }
 0x99e   :  { %v1590_v22 = vsel %vm1586_vm7, %v1584_v27, %v1588_v59  ;;  %v1818_v27 = vadd.f32 1e-05, %v1814_v53 }
 0x99f   :  { %v1592_v61 = vsel %vm704_vm2, %v1590_v22, -1e+30  ;;  %vm1878_vm2 = vweird.f32 %v1871_v0 }
 0x9a0   :  { %v1594_v7 = vsel %vm370_vm12, %v1592_v61, -inf  ;;  %vm1880_vm15 = vmor %vm1878_vm2, %vm1879_vm13 }
 0x9a1   :  { %1595 = vmax.xlane.f32.xlu2 %v1594_v7  ;;  %v1881_v28 = vsel %vm1880_vm15, %v2043_v36, %v1877_v16  ;;  %v1728_v36 = vld [vmem:[%s2862_s3 + $0x100] sm:$0xff] }
 0x9a2   :  { %v1882_v62 = vperm.slane %v1881_v28, 3 }
 0x9b7   :  { %v1579_v1 = vpop.permute.xlu0 %1578 }
 0x9b8   :  { %v1583_v24 = vadd.f32 %v1581_v45, %v1579_v1  ;;  %v1815_v1 = vperm.slane %v1814_v53, 2 }
 0x9ba   :  { %v1585_v4 = vadd.f32 %v1583_v24, %v1570_v13 }
 0x9bc   :  { %vm1587_vm10 = vcmp.gt.f32.partialorder %v1585_v4, 0.0  ;;  %v1589_v31 = vmul.f32 0.2, %v1585_v4 }
 0x9be   :  { %v1591_v23 = vsel %vm1587_vm10, %v1585_v4, %v1589_v31  ;;  %v1730_v31 = vld [vmem:[%s2862_s3 + $0x110] sm:$0xff] }
 0x9bf   :  { %v1593_v25 = vsel %vm705_vm8, %v1591_v23, -1e+30  ;;  %v1832_v23 = vperm.slane %v1814_v53, 0  ;;  %1778 = vmatpush.msrb.mxu2 %v1730_v31 }
 0x9c0   :  { %v1597_v55 = vsel %vm370_vm12, %v1593_v25, -inf }
 0x9c1   :  { %1598 = vmax.xlane.f32.xlu1 %v1597_v55  ;;  %v1835_v55 = vperm.slane %v1814_v53, 1 }
 0x9e0   :  { %v1700_v47 = vpop.f32.mrf.mxu2 }
 0x9e1   :  { %v1701_v5 = vadd.f32 %v2009_v63, %v1700_v47 }
 0x9e3   :  { %v1726_v2 = vadd.f32 %v1723_v35, %v1701_v5 }
 0x9e5   :  { %v1870_v9 = vsub.f32 %v1726_v2, %v1869_v6 }
 0x9e7   :  { %v1883_v11 = vmul.f32 %v1882_v62, %v1870_v9  ;;  %v1842_v9 = vld [vmem:[%s2862_s3 + $0x148] sm:$0xf] }
 0x9e9   :  { %v1885_v30 = vmul.f32 %v1884_v39, %v1883_v11  ;;  %v1846_v39 = vadd.f32 1e-05, %v1842_v9 }
 0x9eb   :  { %v1887_v14 = vadd.f32 %v1886_v29, %v1885_v30 }
 0x9ed   :  { %v1888_v34 = vmax.f32 %v1887_v14, 0.0 }
 0x9ef   :  { %1893 = vst.msk [vmem:[%s2863_s4 + $0x20] sm:$0xff] %vm98_vm1, %v1888_v34 }
 0xa14   :  { %v1596_v37 = vpop.xlane.xlu2 %1595 }
 0xa15   :  { %v1600_v43 = vsub.f32 %v1592_v61, %v1596_v37  ;;  %v2011_v37 = vld [vmem:[%s2862_s3 + $0x118] ss:$0 sm:$0xff] }
 0xa17   :  { %v1602_v44 = vmul.f32 1.442695, %v1600_v43 }
 0xa19   :  { %2044 = vpow2.f32 %v1602_v44  ;;  %v2008_v44 = vld [vmem:[%s2862_s3 + $0x50] ss:$0 sm:$0xff] }
 0xa1f   :  { %v2045_v50 = vpop.eup %2044 }
 0xa20   :  { %v1606_v48 = vmul.f32 %v2045_v50, %v2422_v12  ;;  %v1806_v50 = vpop.f32.mrf.mxu0 }
 0xa22   :  { %v1608_v8 = vsel %vm370_vm12, %v1606_v48, 0.0 }
 0xa23   :  { %1609 = vadd.xlane.f32.xlu0 %v1608_v8 }
 0xa34   :  { %v1599_v46 = vpop.xlane.xlu1 %1598 }
 0xa35   :  { %v1601_v20 = vsub.f32 %v1593_v25, %v1599_v46  ;;  %v1729_v25 = vld [vmem:[%s2862_s3 + $0x108] sm:$0xff] }
 0xa36   :  { %1779 = vmatpush.msrb.mxu2 %v1729_v25 }
 0xa37   :  { %v1604_v51 = vmul.f32 1.442695, %v1601_v20  ;;  %v1334_v20 = vadd.f32 %v2008_v44, %v2762_v17 }
 0xa38   :  { %1780 = vmatpush.msrb.mxu2 %v1728_v36 }
 0xa39   :  { %2046 = vpow2.f32 %v1604_v51 }
 0xa3a   :  { %1781 = vmatpush.msrb.mxu2 %v1727_v40 }
 0xa3f   :  { %v2047_v54 = vpop.eup %2046 }
 0xa40   :  { %v1607_v42 = vmul.f32 %v2047_v54, %v2434_v49  ;;  %v2056_v49 = vld [vmem:[%s2861_s1 + $0x108] sm:$0xff]  ;;  %v1843_v54 = vperm.slane %v1842_v9, 2 }
 0xa42   :  { %v1611_v56 = vsel %vm370_vm12, %v1607_v42, 0.0 }
 0xa43   :  { %1612 = vadd.xlane.f32.xlu2 %v1611_v56 }
 0xa96   :  { %v1610_v57 = vpop.xlane.xlu0 %1609 }
 0xa97   :  { %v1614_v26 = vadd.f32 1e-16, %v1610_v57 }
 0xa99   :  { %2048 = vrcp.f32 %v1614_v26  ;;  %v1860_v26 = vperm.slane %v1842_v9, 0 }
 0xa9f   :  { %v2049_v15 = vpop.eup %2048 }
 0xaa0   :  { %v1618_v45 = vmul.f32 %v2049_v15, %v1606_v48 }
 0xaa2   :  { %1987 = vmatmul.msk.f32.vlgmr.msrb.gmra.mxu1 %vm370_vm12, %v1618_v45 }
 0xab6   :  { %v1613_v12 = vpop.xlane.xlu2 %1612 }
 0xab7   :  { %v1615_v60 = vadd.f32 1e-16, %v1613_v12  ;;  %v1863_v12 = vperm.slane %v1842_v9, 1 }
 0xab9   :  { %2050 = vrcp.f32 %v1615_v60 }
 0xaba   :  { %2052 = vrsqrt.f32 %v1818_v27 }
 0xabb   :  { %2054 = vrsqrt.f32 %v1846_v39 }
 0xabf   :  { %v2051_v52 = vpop.eup %2050 }
 0xac0   :  { %v1619_v18 = vmul.f32 %v2051_v52, %v1607_v42  ;;  %v2053_v59 = vpop.eup %2052  ;;  %v1809_v52 = vpop.f32.mrf.mxu0 }
 0xac1   :  { %v1820_v22 = vmul.f32 %v2053_v59, %v1818_v27  ;;  %vm1826_vm8 = vweird.f32 %v2053_v59  ;;  %v2055_v11 = vpop.eup %2054 }
 0xac2   :  { %1988 = vmatmul.msk.f32.gmra.mxu1 %vm370_vm12, %v1619_v18  ;;  %vm1825_vm12 = vweird.f32 %v1818_v27  ;;  %v1848_v29 = vmul.f32 %v2055_v11, %v1846_v39  ;;  %vm1854_vm3 = vweird.f32 %v2055_v11  ;;  %v1337_v18 = vadd.f32 %v2008_v44, %v2764_v19 }
 0xac3   :  { %v1821_v61 = vmul.f32 %v2053_v59, %v1820_v22  ;;  %vm1827_vm0 = vmor %vm1825_vm12, %vm1826_vm8 }
 0xac4   :  { %v1849_v30 = vmul.f32 %v2055_v11, %v1848_v29 }
 0xac5   :  { %v1822_v7 = vmul.f32 0.5, %v1821_v61 }
 0xac6   :  { %v1850_v14 = vmul.f32 0.5, %v1849_v30 }
 0xac7   :  { %v1823_v41 = vsub.f32 1.5, %v1822_v7 }
 0xac8   :  { %v1851_v34 = vsub.f32 1.5, %v1850_v14 }
 0xac9   :  { %v1824_v21 = vmul.f32 %v2053_v59, %v1823_v41 }
 0xaca   :  { %1992 = vmatmul.msk.f32.vlgmr.msra.gmra.mxu1 %vm177_vm4, %v2056_v49  ;;  %v1852_v43 = vmul.f32 %v2055_v11, %v1851_v34 }
 0xad2   :  { %1993 = vmatmul.msk.f32.gmra.mxu1 %vm177_vm4, %v2472_v33  ;;  %v1828_v33 = vsel %vm1827_vm0, %v2053_v59, %v1824_v21  ;;  %vm1853_vm4 = vweird.f32 %v1846_v39 }
 0xad3   :  { %v1829_v4 = vperm.slane %v1828_v33, 3  ;;  %vm1855_vm9 = vmor %vm1853_vm4, %vm1854_vm3 }
 0xad4   :  { %v1856_v46 = vsel %vm1855_vm9, %v2055_v11, %v1852_v43 }
 0xad5   :  { %v1857_v56 = vperm.slane %v1856_v46, 3 }
 0xb1f   :  { %v1644_v13 = vpop.f32.mrf.mxu1 }
 0xb20   :  { %v1645_v24 = vadd.f32 %v2010_v58, %v1644_v13 }
 0xb22   :  { %v1816_v32 = vsub.f32 %v1645_v24, %v1815_v1 }
 0xb24   :  { %v1830_v0 = vmul.f32 %v1829_v4, %v1816_v32 }
 0xb26   :  { %v1833_v38 = vmul.f32 %v1832_v23, %v1830_v0 }
 0xb28   :  { %v1836_v3 = vadd.f32 %v1835_v55, %v1833_v38 }
 0xb2a   :  { %v1838_v10 = vmax.f32 %v1836_v3, 0.0 }
 0xb2c   :  { %1889 = vst.msk [vmem:[%s2863_s4] sm:$0xff] %vm98_vm1, %v1838_v10 }
 0xb3f   :  { %v1647_v16 = vpop.f32.mrf.mxu1 }
 0xb40   :  { %v1648_v63 = vadd.f32 %v2010_v58, %v1647_v16 }
 0xb42   :  { %v1817_v47 = vsub.f32 %v1648_v63, %v1815_v1 }
 0xb44   :  { %v1831_v28 = vmul.f32 %v1829_v4, %v1817_v47 }
 0xb46   :  { %v1834_v5 = vmul.f32 %v1832_v23, %v1831_v28 }
 0xb47   :  { %v1753_v6 = vpop.f32.mrf.mxu1 }
 0xb48   :  { %v1837_v35 = vadd.f32 %v1835_v55, %v1834_v5  ;;  %1994 = vmatmul.msk.f32.vlgmr.msrb.gmra.mxu2 %vm98_vm1, %v1753_v6 }
 0xb4a   :  { %v1839_v2 = vmax.f32 %v1837_v35, 0.0 }
 0xb4c   :  { %1890 = vst.msk [vmem:[%s2863_s4 + $0x8] sm:$0xff] %vm98_vm1, %v1839_v2 }
 0xb4f   :  { %v1756_v62 = vpop.f32.mrf.mxu1 }
 0xb50   :  { %1995 = vmatmul.msk.f32.gmra.mxu2 %vm98_vm1, %v1756_v62 }
 0xbcb   :  { %v1783_v48 = vpop.f32.mrf.mxu2 }
 0xbcc   :  { %v1784_v8 = vadd.f32 %v2011_v37, %v1783_v48 }
 0xbce   :  { %v1812_v51 = vadd.f32 %v1806_v50, %v1784_v8 }
 0xbd0   :  { %v1840_v42 = vadd.f32 %v1812_v51, %v1334_v20 }
 0xbd2   :  { %v1844_v57 = vsub.f32 %v1840_v42, %v1843_v54 }
 0xbd3   :  { %v1786_v15 = vpop.f32.mrf.mxu2 }
 0xbd4   :  { %v1858_v45 = vmul.f32 %v1857_v56, %v1844_v57  ;;  %v1787_v60 = vadd.f32 %v2011_v37, %v1786_v15 }
 0xbd6   :  { %v1861_v49 = vmul.f32 %v1860_v26, %v1858_v45  ;;  %v1813_v53 = vadd.f32 %v1809_v52, %v1787_v60 }
 0xbd8   :  { %v1864_v27 = vadd.f32 %v1863_v12, %v1861_v49  ;;  %v1841_v59 = vadd.f32 %v1813_v53, %v1337_v18 }
 0xbda   :  { %v1866_v22 = vmax.f32 %v1864_v27, 0.0  ;;  %v1845_v61 = vsub.f32 %v1841_v59, %v1843_v54 }
 0xbdc   :  { %1891 = vst.msk [vmem:[%s2863_s4 + $0x10] sm:$0xff] %vm98_vm1, %v1866_v22  ;;  %v1859_v17 = vmul.f32 %v1857_v56, %v1845_v61 }
 0xbde   :  { %v1862_v7 = vmul.f32 %v1860_v26, %v1859_v17 }
 0xbe0   :  { %v1865_v41 = vadd.f32 %v1863_v12, %v1862_v7 }
 0xbe2   :  { %v1867_v21 = vmax.f32 %v1865_v41, 0.0 }
 0xbe4   :  { %1892 = vst.msk [vmem:[%s2863_s4 + $0x18] sm:$0xff] %vm98_vm1, %v1867_v21 }

</bundles_post_ra>
